<compile_context>
chip_gen: v5e
topology: v5e:2x2
jax: 0.10.0
libtpu: 0.0.40
codegen_flags: <defaults>
</compile_context>

<pallas_src>
import math
import numpy as np
import jax
import jax.numpy as jnp
from jax import lax
from jax.experimental import pallas as pl
from jax.experimental.pallas import tpu as pltpu

# ---- small config consistent with the module (n_embd_per_head * n_head = C) ----
B = 2                 # batch
T = 8                 # sequence length
NH = 4                # n_head
HD = 32               # n_embd_per_head
C = NH * HD           # 128
BT = B * T            # 16 flattened rows
NB = NH * BT          # 64 fused score columns, ordered (head, batch, key_pos)
HID4 = 4 * C          # 512
NHIDDEN = (2 * HID4) // 3
if NHIDDEN % 256:
    NHIDDEN += 256 - NHIDDEN % 256   # find_multiple -> 512
EPS = 1e-5
ROPE_BASE = 10000.0


def _rms(x, scale):
    var = jnp.mean(x.astype(jnp.float32) ** 2, axis=-1, keepdims=True)
    return (x * lax.rsqrt(var + EPS)) * scale


# ----------------------------------------------------------------------------
# Fused kernel: RMSNorm -> qkv(+rot) proj -> RoPE -> causal MHA -> c_proj -> residual
#               -> RMSNorm -> SwiGLU MLP -> residual
# ----------------------------------------------------------------------------
def fused_block_kernel(x_ref, g1_ref, g2_ref, wqkvr_ref, wc_ref, w12_ref, w3_ref,
                       cos_ref, sin_ref, bias_ref, hmask_ref, bones_ref, out_ref):
    x = x_ref[...]                                              # (BT, C) f32

    # ---------------- attention branch ----------------
    xn = _rms(x, g1_ref[...])
    proj = jnp.dot(xn.astype(jnp.bfloat16), wqkvr_ref[...],
                   preferred_element_type=jnp.float32)          # (BT, 5C)
    q, k, v = proj[:, :C], proj[:, C:2 * C], proj[:, 2 * C:3 * C]
    q_rot = proj[:, 3 * C:4 * C]                                # rotate_half(q), folded in weights
    k_rot = proj[:, 4 * C:5 * C]                                # rotate_half(k)

    cos = cos_ref[...]                                          # (BT, C)
    sin = sin_ref[...]
    qe = q * cos + q_rot * sin                                  # RoPE (f32)
    ke = k * cos + k_rot * sin

    # All (batch, head) pairs at once: tile keys/values along sublanes, zero non-head lanes.
    hmask = hmask_ref[...]                                      # (NB, C) 0/1
    ktm = jnp.concatenate([ke] * NH, axis=0) * hmask            # (NB, C)
    vtm = jnp.concatenate([v] * NH, axis=0) * hmask             # (NB, C)

    s = lax.dot_general(qe, ktm, (((1,), (1,)), ((), ())),
                        preferred_element_type=jnp.float32)     # (BT, NB) per-head scores
    s = s * (1.0 / math.sqrt(HD)) + bias_ref[...]               # causal + same-batch mask
    m = jnp.max(s, axis=-1, keepdims=True)                      # row max: valid per-block shift
    p = jnp.exp(s - m)                                          # masked cols -> 0
    denom = jnp.dot(p, bones_ref[...],
                    preferred_element_type=jnp.float32)         # per-(head,batch) block sums
    inv = pl.reciprocal(denom, approx=True)
    pn = jnp.where(denom > 0.0, p * inv, 0.0)                   # softmax; 0 on fully-masked blocks
    attn = jnp.dot(pn, vtm, preferred_element_type=jnp.float32)  # (BT, C)

    attn_out = jnp.dot(attn.astype(jnp.bfloat16), wc_ref[...],
                       preferred_element_type=jnp.float32)
    x1 = x + attn_out                                           # residual 1

    # ---------------- MLP branch ----------------
    xn2 = _rms(x1, g2_ref[...])
    h12 = jnp.dot(xn2.astype(jnp.bfloat16), w12_ref[...],
                  preferred_element_type=jnp.float32)           # (BT, 2*NHIDDEN)
    h1, h2 = h12[:, :NHIDDEN], h12[:, NHIDDEN:]
    h = (h1 * jax.nn.sigmoid(h1)) * h2                          # SiLU(fc1) * fc2
    out_ref[...] = x1 + jnp.dot(h.astype(jnp.bfloat16), w3_ref[...],
                                preferred_element_type=jnp.float32)


def _full(shape):
    nd = len(shape)
    return pl.BlockSpec(shape, lambda i, nd=nd: (0,) * nd)


def block_forward(x, params):
    Bx, Tx, Cx = x.shape
    x2d = x.reshape(Bx * Tx, Cx)
    inputs = (x2d, params["g1"], params["g2"], params["wqkvr"], params["wc"],
              params["w12"], params["w3"], params["cosF"], params["sinF"],
              params["attn_bias"], params["hmask"], params["block_ones"])
    out2d = pl.pallas_call(
        fused_block_kernel,
        out_shape=jax.ShapeDtypeStruct((Bx * Tx, Cx), jnp.float32),
        grid=(1,),
        in_specs=[_full(a.shape) for a in inputs],
        out_specs=_full((Bx * Tx, Cx)),
        compiler_params=pltpu.CompilerParams(dimension_semantics=("arbitrary",)),
    )(*inputs)
    return out2d.reshape(Bx, Tx, Cx)


# ---------------------------- pure-JAX reference ----------------------------
def ref_forward(x, params):
    f32 = jnp.float32
    g1, g2 = params["g1"], params["g2"]
    wq, wk, wv = params["wq"].astype(f32), params["wk"].astype(f32), params["wv"].astype(f32)
    wc, w3 = params["wc"].astype(f32), params["w3"].astype(f32)
    w1, w2 = params["w1"].astype(f32), params["w2"].astype(f32)
    cos, sin = params["cos_hd"], params["sin_hd"]               # (T, HD)
    Bx, Tx, Cx = x.shape

    def heads(a):
        return a.reshape(Bx, Tx, NH, HD).transpose(0, 2, 1, 3)  # (B, NH, T, HD)

    def rot_half(a):
        return jnp.concatenate([-a[..., HD // 2:], a[..., :HD // 2]], axis=-1)

    xn = _rms(x, g1)
    qh, kh, vh = heads(xn @ wq), heads(xn @ wk), heads(xn @ wv)
    cb, sb = cos[None, None], sin[None, None]
    qh = qh * cb + rot_half(qh) * sb
    kh = kh * cb + rot_half(kh) * sb
    s = jnp.einsum("bhqd,bhkd->bhqk", qh, kh) / math.sqrt(HD)
    causal = np.tril(np.ones((Tx, Tx), dtype=bool))
    s = jnp.where(causal, s, -jnp.inf)
    p = jax.nn.softmax(s, axis=-1)
    y = jnp.einsum("bhqk,bhkd->bhqd", p, vh).transpose(0, 2, 1, 3).reshape(Bx, Tx, Cx)
    x = x + y @ wc

    xn2 = _rms(x, g2)
    h = jax.nn.silu(xn2 @ w1) * (xn2 @ w2)
    return x + h @ w3


def make_params():
    key = jax.random.PRNGKey(0)
    kq, kk, kv, kc, k1, k2, k3 = jax.random.split(key, 7)
    scale = 0.02

    def w(k, shape):
        return (jax.random.normal(k, shape, jnp.float32) * scale).astype(jnp.bfloat16)

    wq, wk, wv, wc = w(kq, (C, C)), w(kk, (C, C)), w(kv, (C, C)), w(kc, (C, C))
    w1, w2 = w(k1, (C, NHIDDEN)), w(k2, (C, NHIDDEN))
    w3 = w(k3, (NHIDDEN, C))
    g1 = jnp.ones((1, C), jnp.float32)   # RMSNorm scale init = ones
    g2 = jnp.ones((1, C), jnp.float32)

    # LlamaRotaryEmbedding tables, positions 0..T-1
    inv_freq = 1.0 / (ROPE_BASE ** (np.arange(0, HD, 2, dtype=np.float32) / HD))
    t = np.arange(T, dtype=np.float32)
    freqs = np.einsum("i,j->ij", t, inv_freq)                   # (T, HD/2)
    emb = np.concatenate([freqs, freqs], axis=-1)               # (T, HD)
    cos_hd = jnp.asarray(np.cos(emb), jnp.float32)
    sin_hd = jnp.asarray(np.sin(emb), jnp.float32)
    cosF = jnp.asarray(np.tile(np.tile(np.cos(emb), (1, NH)), (B, 1)), jnp.float32)  # (BT, C)
    sinF = jnp.asarray(np.tile(np.tile(np.sin(emb), (1, NH)), (B, 1)), jnp.float32)

    # rotate_half as an exact signed column permutation, folded into the q/k projections
    half = HD // 2
    Rh = np.zeros((HD, HD), np.float32)
    for j in range(half):
        Rh[j + half, j] = -1.0       # out[:, j]      = -x[:, j+half]
        Rh[j, j + half] = 1.0        # out[:, j+half] =  x[:, j]
    Rfull = jnp.asarray(np.kron(np.eye(NH, dtype=np.float32), Rh))       # (C, C)
    wq_rot = (wq.astype(jnp.float32) @ Rfull).astype(jnp.bfloat16)       # exact in bf16
    wk_rot = (wk.astype(jnp.float32) @ Rfull).astype(jnp.bfloat16)

    wqkvr = jnp.concatenate([wq, wk, wv, wq_rot, wk_rot], axis=1)        # (C, 5C) bf16
    w12 = jnp.concatenate([w1, w2], axis=1)                              # (C, 2*NHIDDEN) bf16

    # masks for the fused (head, batch, key_pos) score layout
    col = np.arange(NB)
    col_h = col // BT
    col_b = (col % BT) // T
    col_j = col % T
    row = np.arange(BT)
    row_b = row // T
    row_t = row % T
    allowed = (row_b[:, None] == col_b[None, :]) & (col_j[None, :] <= row_t[:, None])
    attn_bias = jnp.asarray(np.where(allowed, 0.0, -1e30), jnp.float32)         # (BT, NB)
    hmask = jnp.asarray((col_h[:, None] == (np.arange(C) // HD)[None, :])
                        .astype(np.float32))                                     # (NB, C)
    blk = col // T
    block_ones = jnp.asarray((blk[:, None] == blk[None, :]).astype(np.float32))  # (NB, NB)

    return dict(g1=g1, g2=g2, wq=wq, wk=wk, wv=wv, wc=wc, w1=w1, w2=w2, w3=w3,
                wqkvr=wqkvr, w12=w12, cos_hd=cos_hd, sin_hd=sin_hd,
                cosF=cosF, sinF=sinF, attn_bias=attn_bias, hmask=hmask,
                block_ones=block_ones)


if __name__ == "__main__":
    params = make_params()
    xkey = jax.random.fold_in(jax.random.PRNGKey(0), 123)
    x = jax.random.normal(xkey, (B, T, C), jnp.float32)

    out = jax.block_until_ready(jax.jit(block_forward)(x, params))
    ref = jax.block_until_ready(ref_forward(x, params))

    np.testing.assert_allclose(np.asarray(out, dtype=np.float32),
                               np.asarray(ref, dtype=np.float32),
                               rtol=5e-3, atol=5e-3)
    print("KERNEL_OK")
</pallas_src>

<mosaic_0001>
module attributes {stable_mosaic.version = 11 : i64} {
  func.func @fused_block_kernel(%arg0: i32, %arg1: memref<16x128xf32, #tpu.memory_space<vmem>>, %arg2: memref<1x128xf32, #tpu.memory_space<vmem>>, %arg3: memref<1x128xf32, #tpu.memory_space<vmem>>, %arg4: memref<128x640xbf16, #tpu.memory_space<vmem>>, %arg5: memref<128x128xbf16, #tpu.memory_space<vmem>>, %arg6: memref<128x1024xbf16, #tpu.memory_space<vmem>>, %arg7: memref<512x128xbf16, #tpu.memory_space<vmem>>, %arg8: memref<16x128xf32, #tpu.memory_space<vmem>>, %arg9: memref<16x128xf32, #tpu.memory_space<vmem>>, %arg10: memref<16x64xf32, #tpu.memory_space<vmem>>, %arg11: memref<64x128xf32, #tpu.memory_space<vmem>>, %arg12: memref<64x64xf32, #tpu.memory_space<vmem>>, %arg13: memref<16x128xf32, #tpu.memory_space<vmem>>) attributes {dimension_semantics = [#tpu.dimension_semantics<arbitrary>], iteration_bounds = array<i64: 1>, scalar_prefetch = 0 : i64, scratch_operands = 0 : i64, tpu.core_type = #tpu.core_type<tc>, window_params = [{pipeline_mode = #tpu.pipeline_mode<synchronous>, transform_indices = @transform_0, window_bounds = array<i64: 16, 128>}, {pipeline_mode = #tpu.pipeline_mode<synchronous>, transform_indices = @transform_1, window_bounds = array<i64: 1, 128>}, {pipeline_mode = #tpu.pipeline_mode<synchronous>, transform_indices = @transform_2, window_bounds = array<i64: 1, 128>}, {pipeline_mode = #tpu.pipeline_mode<synchronous>, transform_indices = @transform_3, window_bounds = array<i64: 128, 640>}, {pipeline_mode = #tpu.pipeline_mode<synchronous>, transform_indices = @transform_4, window_bounds = array<i64: 128, 128>}, {pipeline_mode = #tpu.pipeline_mode<synchronous>, transform_indices = @transform_5, window_bounds = array<i64: 128, 1024>}, {pipeline_mode = #tpu.pipeline_mode<synchronous>, transform_indices = @transform_6, window_bounds = array<i64: 512, 128>}, {pipeline_mode = #tpu.pipeline_mode<synchronous>, transform_indices = @transform_7, window_bounds = array<i64: 16, 128>}, {pipeline_mode = #tpu.pipeline_mode<synchronous>, transform_indices = @transform_8, window_bounds = array<i64: 16, 128>}, {pipeline_mode = #tpu.pipeline_mode<synchronous>, transform_indices = @transform_9, window_bounds = array<i64: 16, 64>}, {pipeline_mode = #tpu.pipeline_mode<synchronous>, transform_indices = @transform_10, window_bounds = array<i64: 64, 128>}, {pipeline_mode = #tpu.pipeline_mode<synchronous>, transform_indices = @transform_11, window_bounds = array<i64: 64, 64>}, {pipeline_mode = #tpu.pipeline_mode<synchronous>, transform_indices = @transform_12, window_bounds = array<i64: 16, 128>}]} {
    %c0 = arith.constant 0 : index
    %c0_0 = arith.constant 0 : index
    %0 = vector.load %arg1[%c0, %c0_0] : memref<16x128xf32, #tpu.memory_space<vmem>>, vector<16x128xf32>
    %c0_1 = arith.constant 0 : index
    %c0_2 = arith.constant 0 : index
    %1 = vector.load %arg2[%c0_1, %c0_2] : memref<1x128xf32, #tpu.memory_space<vmem>>, vector<1x128xf32>
    %2 = arith.mulf %0, %0 : vector<16x128xf32>
    %cst = arith.constant dense<0.000000e+00> : vector<16xf32>
    %3 = vector.multi_reduction <add>, %2, %cst [1] : vector<16x128xf32> to vector<16xf32>
    %4 = vector.shape_cast %3 : vector<16xf32> to vector<16x1xf32>
    %cst_3 = arith.constant 1.280000e+02 : f32
    %5 = vector.broadcast %cst_3 : f32 to vector<16x1xf32>
    %6 = arith.divf %4, %5 : vector<16x1xf32>
    %cst_4 = arith.constant 9.99999974E-6 : f32
    %7 = vector.broadcast %cst_4 : f32 to vector<16x1xf32>
    %8 = arith.addf %6, %7 : vector<16x1xf32>
    %9 = math.rsqrt %8 : vector<16x1xf32>
    %10 = vector.broadcast %9 : vector<16x1xf32> to vector<16x128xf32>
    %11 = arith.mulf %0, %10 : vector<16x128xf32>
    %12 = vector.broadcast %1 : vector<1x128xf32> to vector<16x128xf32>
    %13 = arith.mulf %11, %12 : vector<16x128xf32>
    %14 = arith.truncf %13 : vector<16x128xf32> to vector<16x128xbf16>
    %c0_5 = arith.constant 0 : index
    %c0_6 = arith.constant 0 : index
    %15 = vector.load %arg4[%c0_5, %c0_6] : memref<128x640xbf16, #tpu.memory_space<vmem>>, vector<128x640xbf16>
    %cst_7 = arith.constant dense<0.000000e+00> : vector<16x640xf32>
    %16 = tpu.matmul %14, %15, %cst_7 {dimension_numbers = #tpu.dot_dimension_numbers<[1], [0], [0], [1], [0, 0, 1, 1], [], []>} : vector<16x128xbf16>, vector<128x640xbf16>, vector<16x640xf32> -> vector<16x640xf32>
    %17 = vector.extract_strided_slice %16 {offsets = [0, 0], sizes = [16, 128], strides = [1, 1]} : vector<16x640xf32> to vector<16x128xf32>
    %18 = vector.extract_strided_slice %16 {offsets = [0, 128], sizes = [16, 128], strides = [1, 1]} : vector<16x640xf32> to vector<16x128xf32>
    %19 = vector.extract_strided_slice %16 {offsets = [0, 256], sizes = [16, 128], strides = [1, 1]} : vector<16x640xf32> to vector<16x128xf32>
    %20 = vector.extract_strided_slice %16 {offsets = [0, 384], sizes = [16, 128], strides = [1, 1]} : vector<16x640xf32> to vector<16x128xf32>
    %21 = vector.extract_strided_slice %16 {offsets = [0, 512], sizes = [16, 128], strides = [1, 1]} : vector<16x640xf32> to vector<16x128xf32>
    %c0_8 = arith.constant 0 : index
    %c0_9 = arith.constant 0 : index
    %22 = vector.load %arg8[%c0_8, %c0_9] : memref<16x128xf32, #tpu.memory_space<vmem>>, vector<16x128xf32>
    %c0_10 = arith.constant 0 : index
    %c0_11 = arith.constant 0 : index
    %23 = vector.load %arg9[%c0_10, %c0_11] : memref<16x128xf32, #tpu.memory_space<vmem>>, vector<16x128xf32>
    %24 = arith.mulf %17, %22 : vector<16x128xf32>
    %25 = arith.mulf %20, %23 : vector<16x128xf32>
    %26 = arith.addf %24, %25 : vector<16x128xf32>
    %27 = arith.mulf %18, %22 : vector<16x128xf32>
    %28 = arith.mulf %21, %23 : vector<16x128xf32>
    %29 = arith.addf %27, %28 : vector<16x128xf32>
    %c0_12 = arith.constant 0 : index
    %c0_13 = arith.constant 0 : index
    %30 = vector.load %arg11[%c0_12, %c0_13] : memref<64x128xf32, #tpu.memory_space<vmem>>, vector<64x128xf32>
    %31 = tpu.concatenate %29, %29, %29, %29 in 0 : vector<16x128xf32>, vector<16x128xf32>, vector<16x128xf32>, vector<16x128xf32> -> vector<64x128xf32>
    %32 = arith.mulf %31, %30 : vector<64x128xf32>
    %33 = tpu.concatenate %19, %19, %19, %19 in 0 : vector<16x128xf32>, vector<16x128xf32>, vector<16x128xf32>, vector<16x128xf32> -> vector<64x128xf32>
    %34 = arith.mulf %33, %30 : vector<64x128xf32>
    %cst_14 = arith.constant dense<0.000000e+00> : vector<16x64xf32>
    %35 = tpu.matmul %26, %32, %cst_14 {dimension_numbers = #tpu.dot_dimension_numbers<[1], [1], [0], [0], [0, 0, 1, 0], [], []>} : vector<16x128xf32>, vector<64x128xf32>, vector<16x64xf32> -> vector<16x64xf32>
    %cst_15 = arith.constant 0.176776692 : f32
    %36 = vector.broadcast %cst_15 : f32 to vector<16x64xf32>
    %37 = arith.mulf %35, %36 : vector<16x64xf32>
    %c0_16 = arith.constant 0 : index
    %c0_17 = arith.constant 0 : index
    %38 = vector.load %arg10[%c0_16, %c0_17] : memref<16x64xf32, #tpu.memory_space<vmem>>, vector<16x64xf32>
    %39 = arith.addf %37, %38 : vector<16x64xf32>
    %cst_18 = arith.constant dense<0xFF800000> : vector<16xf32>
    %40 = vector.multi_reduction <maximumf>, %39, %cst_18 [1] : vector<16x64xf32> to vector<16xf32>
    %41 = vector.shape_cast %40 : vector<16xf32> to vector<16x1xf32>
    %42 = vector.broadcast %41 : vector<16x1xf32> to vector<16x64xf32>
    %43 = arith.subf %39, %42 : vector<16x64xf32>
    %44 = math.exp %43 : vector<16x64xf32>
    %c0_19 = arith.constant 0 : index
    %c0_20 = arith.constant 0 : index
    %45 = vector.load %arg12[%c0_19, %c0_20] : memref<64x64xf32, #tpu.memory_space<vmem>>, vector<64x64xf32>
    %cst_21 = arith.constant dense<0.000000e+00> : vector<16x64xf32>
    %46 = tpu.matmul %44, %45, %cst_21 {dimension_numbers = #tpu.dot_dimension_numbers<[1], [0], [0], [1], [0, 0, 1, 1], [], []>} : vector<16x64xf32>, vector<64x64xf32>, vector<16x64xf32> -> vector<16x64xf32>
    %47 = tpu.reciprocal %46 {approx = true} : vector<16x64xf32> -> vector<16x64xf32>
    %cst_22 = arith.constant 0.000000e+00 : f32
    %48 = vector.broadcast %cst_22 : f32 to vector<16x64xf32>
    %49 = arith.cmpf ogt, %46, %48 : vector<16x64xf32>
    %50 = arith.mulf %44, %47 : vector<16x64xf32>
    %cst_23 = arith.constant 0.000000e+00 : f32
    %51 = vector.broadcast %cst_23 : f32 to vector<16x64xf32>
    %52 = arith.select %49, %50, %51 : vector<16x64xi1>, vector<16x64xf32>
    %cst_24 = arith.constant dense<0.000000e+00> : vector<16x128xf32>
    %53 = tpu.matmul %52, %34, %cst_24 {dimension_numbers = #tpu.dot_dimension_numbers<[1], [0], [0], [1], [0, 0, 1, 1], [], []>} : vector<16x64xf32>, vector<64x128xf32>, vector<16x128xf32> -> vector<16x128xf32>
    %54 = arith.truncf %53 : vector<16x128xf32> to vector<16x128xbf16>
    %c0_25 = arith.constant 0 : index
    %c0_26 = arith.constant 0 : index
    %55 = vector.load %arg5[%c0_25, %c0_26] : memref<128x128xbf16, #tpu.memory_space<vmem>>, vector<128x128xbf16>
    %cst_27 = arith.constant dense<0.000000e+00> : vector<16x128xf32>
    %56 = tpu.matmul %54, %55, %cst_27 {dimension_numbers = #tpu.dot_dimension_numbers<[1], [0], [0], [1], [0, 0, 1, 1], [], []>} : vector<16x128xbf16>, vector<128x128xbf16>, vector<16x128xf32> -> vector<16x128xf32>
    %57 = arith.addf %0, %56 : vector<16x128xf32>
    %c0_28 = arith.constant 0 : index
    %c0_29 = arith.constant 0 : index
    %58 = vector.load %arg3[%c0_28, %c0_29] : memref<1x128xf32, #tpu.memory_space<vmem>>, vector<1x128xf32>
    %59 = arith.mulf %57, %57 : vector<16x128xf32>
    %cst_30 = arith.constant dense<0.000000e+00> : vector<16xf32>
    %60 = vector.multi_reduction <add>, %59, %cst_30 [1] : vector<16x128xf32> to vector<16xf32>
    %61 = vector.shape_cast %60 : vector<16xf32> to vector<16x1xf32>
    %cst_31 = arith.constant 1.280000e+02 : f32
    %62 = vector.broadcast %cst_31 : f32 to vector<16x1xf32>
    %63 = arith.divf %61, %62 : vector<16x1xf32>
    %cst_32 = arith.constant 9.99999974E-6 : f32
    %64 = vector.broadcast %cst_32 : f32 to vector<16x1xf32>
    %65 = arith.addf %63, %64 : vector<16x1xf32>
    %66 = math.rsqrt %65 : vector<16x1xf32>
    %67 = vector.broadcast %66 : vector<16x1xf32> to vector<16x128xf32>
    %68 = arith.mulf %57, %67 : vector<16x128xf32>
    %69 = vector.broadcast %58 : vector<1x128xf32> to vector<16x128xf32>
    %70 = arith.mulf %68, %69 : vector<16x128xf32>
    %71 = arith.truncf %70 : vector<16x128xf32> to vector<16x128xbf16>
    %c0_33 = arith.constant 0 : index
    %c0_34 = arith.constant 0 : index
    %72 = vector.load %arg6[%c0_33, %c0_34] : memref<128x1024xbf16, #tpu.memory_space<vmem>>, vector<128x1024xbf16>
    %cst_35 = arith.constant dense<0.000000e+00> : vector<16x1024xf32>
    %73 = tpu.matmul %71, %72, %cst_35 {dimension_numbers = #tpu.dot_dimension_numbers<[1], [0], [0], [1], [0, 0, 1, 1], [], []>} : vector<16x128xbf16>, vector<128x1024xbf16>, vector<16x1024xf32> -> vector<16x1024xf32>
    %74 = vector.extract_strided_slice %73 {offsets = [0, 0], sizes = [16, 512], strides = [1, 1]} : vector<16x1024xf32> to vector<16x512xf32>
    %75 = vector.extract_strided_slice %73 {offsets = [0, 512], sizes = [16, 512], strides = [1, 1]} : vector<16x1024xf32> to vector<16x512xf32>
    %76 = arith.negf %74 : vector<16x512xf32>
    %77 = math.exp %76 : vector<16x512xf32>
    %cst_36 = arith.constant 1.000000e+00 : f32
    %78 = vector.broadcast %cst_36 : f32 to vector<16x512xf32>
    %79 = arith.addf %78, %77 : vector<16x512xf32>
    %80 = arith.divf %78, %79 : vector<16x512xf32>
    %81 = arith.mulf %74, %80 : vector<16x512xf32>
    %82 = arith.mulf %81, %75 : vector<16x512xf32>
    %83 = arith.truncf %82 : vector<16x512xf32> to vector<16x512xbf16>
    %c0_37 = arith.constant 0 : index
    %c0_38 = arith.constant 0 : index
    %84 = vector.load %arg7[%c0_37, %c0_38] : memref<512x128xbf16, #tpu.memory_space<vmem>>, vector<512x128xbf16>
    %cst_39 = arith.constant dense<0.000000e+00> : vector<16x128xf32>
    %85 = tpu.matmul %83, %84, %cst_39 {dimension_numbers = #tpu.dot_dimension_numbers<[1], [0], [0], [1], [0, 0, 1, 1], [], []>} : vector<16x512xbf16>, vector<512x128xbf16>, vector<16x128xf32> -> vector<16x128xf32>
    %86 = arith.addf %57, %85 : vector<16x128xf32>
    %c0_40 = arith.constant 0 : index
    %c0_41 = arith.constant 0 : index
    %87 = vector.load %arg13[%c0_40, %c0_41] : memref<16x128xf32, #tpu.memory_space<vmem>>, vector<16x128xf32>
    tpu.vector_store %arg13[%c0_40, %c0_41], %86 {strides = array<i32>} : memref<16x128xf32, #tpu.memory_space<vmem>>, vector<16x128xf32>,
    return
  }
  func.func @transform_0(%arg0: i32) -> (i32, i32) {
    %c0_i32 = arith.constant 0 : i32
    %c0_i32_0 = arith.constant 0 : i32
    %c0_i32_1 = arith.constant 0 : i32
    return %c0_i32, %c0_i32_0 : i32, i32
  }
  func.func @transform_1(%arg0: i32) -> (i32, i32) {
    %c0_i32 = arith.constant 0 : i32
    %c0_i32_0 = arith.constant 0 : i32
    %c0_i32_1 = arith.constant 0 : i32
    return %c0_i32, %c0_i32_0 : i32, i32
  }
  func.func @transform_2(%arg0: i32) -> (i32, i32) {
    %c0_i32 = arith.constant 0 : i32
    %c0_i32_0 = arith.constant 0 : i32
    %c0_i32_1 = arith.constant 0 : i32
    return %c0_i32, %c0_i32_0 : i32, i32
  }
  func.func @transform_3(%arg0: i32) -> (i32, i32) {
    %c0_i32 = arith.constant 0 : i32
    %c0_i32_0 = arith.constant 0 : i32
    %c0_i32_1 = arith.constant 0 : i32
    return %c0_i32, %c0_i32_0 : i32, i32
  }
  func.func @transform_4(%arg0: i32) -> (i32, i32) {
    %c0_i32 = arith.constant 0 : i32
    %c0_i32_0 = arith.constant 0 : i32
    %c0_i32_1 = arith.constant 0 : i32
    return %c0_i32, %c0_i32_0 : i32, i32
  }
  func.func @transform_5(%arg0: i32) -> (i32, i32) {
    %c0_i32 = arith.constant 0 : i32
    %c0_i32_0 = arith.constant 0 : i32
    %c0_i32_1 = arith.constant 0 : i32
    return %c0_i32, %c0_i32_0 : i32, i32
  }
  func.func @transform_6(%arg0: i32) -> (i32, i32) {
    %c0_i32 = arith.constant 0 : i32
    %c0_i32_0 = arith.constant 0 : i32
    %c0_i32_1 = arith.constant 0 : i32
    return %c0_i32, %c0_i32_0 : i32, i32
  }
  func.func @transform_7(%arg0: i32) -> (i32, i32) {
    %c0_i32 = arith.constant 0 : i32
    %c0_i32_0 = arith.constant 0 : i32
    %c0_i32_1 = arith.constant 0 : i32
    return %c0_i32, %c0_i32_0 : i32, i32
  }
  func.func @transform_8(%arg0: i32) -> (i32, i32) {
    %c0_i32 = arith.constant 0 : i32
    %c0_i32_0 = arith.constant 0 : i32
    %c0_i32_1 = arith.constant 0 : i32
    return %c0_i32, %c0_i32_0 : i32, i32
  }
  func.func @transform_9(%arg0: i32) -> (i32, i32) {
    %c0_i32 = arith.constant 0 : i32
    %c0_i32_0 = arith.constant 0 : i32
    %c0_i32_1 = arith.constant 0 : i32
    return %c0_i32, %c0_i32_0 : i32, i32
  }
  func.func @transform_10(%arg0: i32) -> (i32, i32) {
    %c0_i32 = arith.constant 0 : i32
    %c0_i32_0 = arith.constant 0 : i32
    %c0_i32_1 = arith.constant 0 : i32
    return %c0_i32, %c0_i32_0 : i32, i32
  }
  func.func @transform_11(%arg0: i32) -> (i32, i32) {
    %c0_i32 = arith.constant 0 : i32
    %c0_i32_0 = arith.constant 0 : i32
    %c0_i32_1 = arith.constant 0 : i32
    return %c0_i32, %c0_i32_0 : i32, i32
  }
  func.func @transform_12(%arg0: i32) -> (i32, i32) {
    %c0_i32 = arith.constant 0 : i32
    %c0_i32_0 = arith.constant 0 : i32
    %c0_i32_1 = arith.constant 0 : i32
    return %c0_i32, %c0_i32_0 : i32, i32
  }
}

</mosaic_0001>

<bundles_post_ra>
// kernel: block_forward.1
= control target key start
LH: loop header
LB: loop body
LE: loop exit
PB: predicated region body
PF: predicated region fallthrough
CT: control target
= control target key end

     0   :  { %17 = vsyncpa [#allocation3], 0  ;;  %s3317_s0 = inlined_call_operand.hbm [shape: f32[16,128], index: 0, kind: input, shape index: {}]   ;;  %s3318_s1 = inlined_call_operand.vmem [shape: f32[1,128], index: 1, kind: input, shape index: {}]   ;;  %s3319_s2 = inlined_call_operand.vmem [shape: f32[1,128], index: 2, kind: input, shape index: {}]   ;;  %s3320_s3 = inlined_call_operand.hbm [shape: bf16[128,640], index: 3, kind: input, shape index: {}]   ;;  %s3321_s4 = inlined_call_operand.hbm [shape: bf16[128,128], index: 4, kind: input, shape index: {}]   ;;  %s3322_s5 = inlined_call_operand.hbm [shape: bf16[128,1024], index: 5, kind: input, shape index: {}]   ;;  %s3323_s6 = inlined_call_operand.hbm [shape: bf16[512,128], index: 6, kind: input, shape index: {}]   ;;  %s3324_s7 = inlined_call_operand.hbm [shape: f32[16,128], index: 7, kind: input, shape index: {}]   ;;  %s3325_s8 = inlined_call_operand.hbm [shape: f32[16,128], index: 8, kind: input, shape index: {}]   ;;  %s3326_s9 = inlined_call_operand.hbm [shape: f32[16,64], index: 9, kind: input, shape index: {}]   ;;  %s3327_s10 = inlined_call_operand.hbm [shape: f32[64,128], index: 10, kind: input, shape index: {}]   ;;  %s3328_s11 = inlined_call_operand.hbm [shape: f32[64,64], index: 11, kind: input, shape index: {}]   ;;  %s3329_s12 = inlined_call_operand.hbm [shape: f32[16,128], index: 12, kind: output, shape index: {}]  }
   0x1   :  { %18 = vsyncpa [#allocation6], 0 }
   0x2   :  { %19 = vsyncpa [#allocation9], 0 }
   0x3   :  { %20 = vsyncpa [#allocation12], 0 }
   0x4   :  { %21 = vsyncpa [#allocation15], 0 }
   0x5   :  { %22 = vsyncpa [#allocation18], 0  ;;  %s45_s23 = sshll.u32 %s3320_s3, 4  ;;  %s46_s23 = int_to_ptr.hbm [resolvable:$true] %s45_s23 }
   0x6   :  { %23 = vsyncpa [#allocation4], 0  ;;  %s2938_s24 = smov [#allocation5]   ;;  %s71_s28 = sshll.u32 %s3322_s5, 4  ;;  %s72_s28 = int_to_ptr.hbm [resolvable:$true] %s71_s28 }
   0x7   :  { %s47_s25 = sshll.u32 %s2938_s24, 4  ;;  %s2939_s29 = smov 320   ;;  %s48_s25 = int_to_ptr.vmem [resolvable:$true] %s47_s25 }
   0x8   :  { %s2940_s30 = smov 20   ;;  %s2941_s13 = smov [#allocation8]  }
   0x9   :  { %53 = dma.hbm_to_vmem [thread:$0]  %s46_s23, 5120, %s48_s25, [#allocation6], %s2939_s29, %s2939_s29, %s2940_s30  }
   0xa   :  { %s73_s14 = sshll.u32 %s2941_s13, 4  ;;  %s2942_s15 = smov 512   ;;  %s74_s14 = int_to_ptr.vmem [resolvable:$true] %s73_s14 }
   0xb   :  { %s2943_s16 = smov 32   ;;  %s97_s18 = sshll.u32 %s3324_s7, 4  ;;  %s98_s18 = int_to_ptr.hbm [resolvable:$true] %s97_s18 }
   0xc   :  { %79 = dma.hbm_to_vmem [thread:$0]  %s72_s28, 8192, %s74_s14, [#allocation9], %s2942_s15, %s2942_s15, %s2943_s16  }
   0xd   :  { %s2944_s19 = smov [#allocation11]   ;;  %s123_s22 = sshll.u32 %s3326_s9, 4  ;;  %s124_s22 = int_to_ptr.hbm [resolvable:$true] %s123_s22 }
   0xe   :  { %s99_s20 = sshll.u32 %s2944_s19, 4  ;;  %s2945_s23 = smov 128   ;;  %s100_s20 = int_to_ptr.vmem [resolvable:$true] %s99_s20 }
   0xf   :  { %s2946_s24 = smov 8   ;;  %s2947_s25 = smov [#allocation14]  }
  0x10   :  { %105 = dma.hbm_to_vmem [thread:$0]  %s98_s18, 256, %s100_s20, [#allocation12], %s2945_s23, %s2945_s23, %s2946_s24  }
  0x11   :  { %s125_s26 = sshll.u32 %s2947_s25, 4  ;;  %s28_s7 = sshll.u32 %s3317_s0, 4  ;;  %s126_s26 = int_to_ptr.vmem [resolvable:$true] %s125_s26  ;;  %s29_s7 = int_to_ptr.hbm [resolvable:$true] %s28_s7 }
  0x12   :  { %131 = dma.hbm_to_vmem [thread:$0]  %s124_s22, 256, %s126_s26, [#allocation15], %s2945_s23, %s2945_s23, %s2946_s24  }
  0x13   :  { %s58_s30 = sshll.u32 %s3321_s4, 4  ;;  %s2948_s13 = smov [#allocation2]   ;;  %s59_s30 = int_to_ptr.hbm [resolvable:$true] %s58_s30 }
  0x14   :  { %s30_s14 = sshll.u32 %s2948_s13, 4  ;;  %s2949_s15 = smov [#allocation7]   ;;  %s31_s14 = int_to_ptr.vmem [resolvable:$true] %s30_s14 }
  0x15   :  { %36 = dma.hbm_to_vmem [thread:$0]  %s29_s7, 256, %s31_s14, [#allocation3], %s2945_s23, %s2945_s23, %s2946_s24  }
  0x16   :  { %s60_s0 = sshll.u32 %s2949_s15, 4  ;;  %s2950_s16 = smov 64   ;;  %s61_s0 = int_to_ptr.vmem [resolvable:$true] %s60_s0 }
  0x17   :  { %s2951_s3 = smov 4   ;;  %s84_s19 = sshll.u32 %s3323_s6, 4  ;;  %s85_s19 = int_to_ptr.hbm [resolvable:$true] %s84_s19 }
  0x18   :  { %66 = dma.hbm_to_vmem [thread:$0]  %s59_s30, 1024, %s61_s0, [#allocation6], %s2950_s16, %s2950_s16, %s2951_s3  }
  0x19   :  { %s2952_s4 = smov [#allocation10]   ;;  %s110_s22 = sshll.u32 %s3325_s8, 4  ;;  %s111_s22 = int_to_ptr.hbm [resolvable:$true] %s110_s22 }
  0x1a   :  { %s86_s20 = sshll.u32 %s2952_s4, 4  ;;  %s2953_s25 = smov [#allocation13]   ;;  %s87_s20 = int_to_ptr.vmem [resolvable:$true] %s86_s20 }
  0x1b   :  { %92 = dma.hbm_to_vmem [thread:$0]  %s85_s19, 4096, %s87_s20, [#allocation9], %s2950_s16, %s2950_s16, %s2951_s3  }
  0x1c   :  { %s112_s26 = sshll.u32 %s2953_s25, 4  ;;  %s136_s7 = sshll.u32 %s3327_s10, 4  ;;  %s113_s26 = int_to_ptr.vmem [resolvable:$true] %s112_s26  ;;  %s137_s7 = int_to_ptr.hbm [resolvable:$true] %s136_s7 }
  0x1d   :  { %118 = dma.hbm_to_vmem [thread:$0]  %s111_s22, 256, %s113_s26, [#allocation12], %s2945_s23, %s2945_s23, %s2946_s24  }
  0x1e   :  { %s149_s29 = sshll.u32 %s3328_s11, 4  ;;  %s2954_s30 = smov [#allocation16]   ;;  %s150_s29 = int_to_ptr.hbm [resolvable:$true] %s149_s29 }
  0x1f   :  { %s138_s8 = sshll.u32 %s2954_s30, 4  ;;  %s2955_s13 = smov [#allocation17]   ;;  %s139_s8 = int_to_ptr.vmem [resolvable:$true] %s138_s8 }
  0x20   :  { %144 = dma.hbm_to_vmem [thread:$0]  %s137_s7, 1024, %s139_s8, [#allocation15], %s2945_s23, %s2945_s23, %s2946_s24  }
  0x21   :  { %s151_s10 = sshll.u32 %s2955_s13, 4  ;;  %s152_s10 = int_to_ptr.vmem [resolvable:$true] %s151_s10 }
  0x22   :  { %157 = dma.hbm_to_vmem [thread:$0]  %s150_s29, 1024, %s152_s10, [#allocation18], %s2945_s23, %s2945_s23, %s2946_s24  }
  0x23   :  { %2924 = dma.done.wait [#allocation3], 256  }
  0x24   :  { %2925 = vsyncadd [#allocation3], 4294967040 }
  0x25   :  { %2926 = dma.done.wait [#allocation6], 6144  }
  0x26   :  { %2927 = vsyncadd [#allocation6], 4294961152 }
  0x27   :  { %2928 = dma.done.wait [#allocation9], 12288  }
  0x28   :  { %2929 = vsyncadd [#allocation9], 4294955008 }
  0x29   :  { %2930 = dma.done.wait [#allocation12], 512  }
  0x2a   :  { %2931 = vsyncadd [#allocation12], 4294966784 }
  0x2b   :  { %2932 = dma.done.wait [#allocation15], 1280  }
  0x2c   :  { %2933 = vsyncadd [#allocation15], 4294966016 }
  0x2d   :  { %2934 = dma.done.wait [#allocation18], 1024  }
  0x2e   :  { %2935 = vsyncadd [#allocation18], 4294966272  ;;  %v3071_v0 = vld [vmem:[#allocation2] sm:$0xff]  ;;  %v1998_v1 = vld [vmem:[#allocation5 + $0x118] sm:$0xf]  ;;  %v2956_v23 = vmov 128.0  }
  0x2f   :  { %v201_v2 = vmul.f32 %v3071_v0, %v3071_v0  ;;  %v2481_v3 = vld [vmem:[#allocation5 + $0x128] sm:$0xf0]  ;;  %v1978_v4 = vld [vmem:[#allocation5 + $0xf0] sm:$0xf]  ;;  %v2476_v5 = vld [vmem:[#allocation5 + $0x100] sm:$0xf0]  ;;  %2610 = vrcp.f32 %v2956_v23 }
  0x30   :  { %v1999_v6 = vor.u32 %v2481_v3, %v1998_v1  ;;  %v3075_v7 = vld [vmem:[#allocation2 + $0x8] sm:$0xff]  ;;  %v1979_v8 = vor.u32 %v2476_v5, %v1978_v4  ;;  %v1958_v10 = vld [vmem:[#allocation5 + $0xc8] sm:$0xf]  ;;  %v1938_v13 = vld [vmem:[#allocation5 + $0xa0] sm:$0xf]  ;;  %vm641_vm7 = vcmask 523264  }
  0x31   :  { %203 = vadd.xlane.f32.xlu0 %v201_v2  ;;  %v202_v9 = vmul.f32 %v3075_v7, %v3075_v7  ;;  %v2471_v11 = vld [vmem:[#allocation5 + $0xd8] sm:$0xf0]  ;;  %v2466_v14 = vld [vmem:[#allocation5 + $0xb0] sm:$0xf0]  ;;  %v2000_v17 = vld [vmem:[#allocation5 + $0x12c] sm:$0xf0] }
  0x32   :  { %502 = vmatpush.bf16.msra.mxu0 %v1999_v6  ;;  %v1959_v12 = vor.u32 %v2471_v11, %v1958_v10  ;;  %v1939_v15 = vor.u32 %v2466_v14, %v1938_v13  ;;  %v2479_v16 = vld [vmem:[#allocation5 + $0x11c] sm:$0xf]  ;;  %v2006_v18 = vld [vmem:[#allocation5 + $0x120] sm:$0xf]  ;;  %v2482_v20 = vld [vmem:[#allocation5 + $0x130] sm:$0xf0] }
  0x33   :  { %v2003_v19 = vor.u32 %v2479_v16, %v2000_v17  ;;  %v2480_v21 = vld [vmem:[#allocation5 + $0x124] sm:$0xf]  ;;  %v2008_v22 = vld [vmem:[#allocation5 + $0x134] sm:$0xf0]  ;;  %v2007_v24 = vor.u32 %v2482_v20, %v2006_v18  ;;  %v2461_v27 = vld [vmem:[#allocation5 + $0x88] sm:$0xf0] }
  0x34   :  { %v2011_v25 = vor.u32 %v2480_v21, %v2008_v22  ;;  %v1918_v26 = vld [vmem:[#allocation5 + $0x78] sm:$0xf]  ;;  %v2474_v29 = vld [vmem:[#allocation5 + $0xf4] sm:$0xf]  ;;  %v1980_v30 = vld [vmem:[#allocation5 + $0x104] sm:$0xf0] }
  0x35   :  { %516 = vmatpush.bf16.msra.mxu1 %v2003_v19  ;;  %530 = vmatpush.bf16.msra.mxu2 %v2007_v24  ;;  %v1919_v28 = vor.u32 %v2461_v27, %v1918_v26  ;;  %v1986_v31 = vld [vmem:[#allocation5 + $0xf8] sm:$0xf]  ;;  %v1983_v32 = vor.u32 %v2474_v29, %v1980_v30  ;;  %v2477_v33 = vld [vmem:[#allocation5 + $0x108] sm:$0xf0]  ;;  %v2475_v34 = vld [vmem:[#allocation5 + $0xfc] sm:$0xf]  ;;  %v3079_v40 = vpop.eup %2610 }
  0x36   :  { %503 = vmatpush.bf16.msra.mxu0 %v1979_v8  ;;  %544 = vmatpush.bf16.msra.mxu3 %v2011_v25  ;;  %v1988_v35 = vld [vmem:[#allocation5 + $0x10c] sm:$0xf0]  ;;  %v1987_v36 = vor.u32 %v2477_v33, %v1986_v31  ;;  %v2456_v39 = vld [vmem:[#allocation5 + $0x60] sm:$0xf0]  ;;  %v2469_v42 = vld [vmem:[#allocation5 + $0xcc] sm:$0xf]  ;;  %vm212_vm0 = vweird.f32 %v3079_v40 }
  0x37   :  { %v1991_v37 = vor.u32 %v2475_v34, %v1988_v35  ;;  %v1898_v38 = vld [vmem:[#allocation5 + $0x50] sm:$0xf]  ;;  %v1960_v43 = vld [vmem:[#allocation5 + $0xdc] sm:$0xf0]  ;;  %v2472_v46 = vld [vmem:[#allocation5 + $0xe0] sm:$0xf0] }
  0x38   :  { %v1899_v41 = vor.u32 %v2456_v39, %v1898_v38  ;;  %v1966_v44 = vld [vmem:[#allocation5 + $0xd0] sm:$0xf]  ;;  %v1963_v45 = vor.u32 %v2469_v42, %v1960_v43  ;;  %v2470_v47 = vld [vmem:[#allocation5 + $0xd4] sm:$0xf]  ;;  %v1968_v48 = vld [vmem:[#allocation5 + $0xe4] sm:$0xf0] }
  0x39   :  { %205 = vadd.xlane.f32.xlu0 %v202_v9  ;;  %517 = vmatpush.bf16.msra.mxu1 %v1983_v32  ;;  %v1967_v49 = vor.u32 %v2472_v46, %v1966_v44  ;;  %v1971_v50 = vor.u32 %v2470_v47, %v1968_v48  ;;  %v208_v51 = vmul.f32 128.0, %v3079_v40  ;;  %v1878_v52 = vld [vmem:[#allocation5 + $0x28] sm:$0xf]  ;;  %v2451_v53 = vld [vmem:[#allocation5 + $0x38] sm:$0xf0]  ;;  %s1838_s17 = sshll.u32 %s3329_s12, 4  ;;  %s1839_s17 = int_to_ptr.hbm [resolvable:$true] %s1838_s17 }
  0x3a   :  { %504 = vmatpush.bf16.msra.mxu0 %v1959_v12  ;;  %531 = vmatpush.bf16.msra.mxu2 %v1987_v36  ;;  %v1879_v54 = vor.u32 %v2451_v53, %v1878_v52  ;;  %v2464_v55 = vld [vmem:[#allocation5 + $0xa4] sm:$0xf]  ;;  %v1940_v56 = vld [vmem:[#allocation5 + $0xb4] sm:$0xf0]  ;;  %v1946_v57 = vld [vmem:[#allocation5 + $0xa8] sm:$0xf] }
  0x3b   :  { %545 = vmatpush.bf16.msra.mxu3 %v1991_v37  ;;  %v1943_v58 = vor.u32 %v2464_v55, %v1940_v56  ;;  %v2467_v59 = vld [vmem:[#allocation5 + $0xb8] sm:$0xf0]  ;;  %v2465_v60 = vld [vmem:[#allocation5 + $0xac] sm:$0xf]  ;;  %v1948_v61 = vld [vmem:[#allocation5 + $0xbc] sm:$0xf0] }
  0x3c   :  { %v1947_v62 = vor.u32 %v2467_v59, %v1946_v57  ;;  %v1951_v63 = vor.u32 %v2465_v60, %v1948_v61  ;;  %v209_v1 = vsub.f32 1.0, %v208_v51  ;;  %v1858_v2 = vld [vmem:[#allocation5] sm:$0xf]  ;;  %v2446_v3 = vld [vmem:[#allocation5 + $0x10] sm:$0xf0] }
  0x3d   :  { %518 = vmatpush.bf16.msra.mxu1 %v1963_v45  ;;  %v1859_v4 = vor.u32 %v2446_v3, %v1858_v2  ;;  %v2459_v5 = vld [vmem:[#allocation5 + $0x7c] sm:$0xf]  ;;  %v1920_v6 = vld [vmem:[#allocation5 + $0x8c] sm:$0xf0]  ;;  %v1926_v8 = vld [vmem:[#allocation5 + $0x80] sm:$0xf] }
  0x3e   :  { %505 = vmatpush.bf16.msra.mxu0 %v1939_v15  ;;  %532 = vmatpush.bf16.msra.mxu2 %v1967_v49  ;;  %v1923_v9 = vor.u32 %v2459_v5, %v1920_v6  ;;  %v2462_v10 = vld [vmem:[#allocation5 + $0x90] sm:$0xf0]  ;;  %v2460_v11 = vld [vmem:[#allocation5 + $0x84] sm:$0xf]  ;;  %v1928_v12 = vld [vmem:[#allocation5 + $0x94] sm:$0xf0]  ;;  %v210_v17 = vmul.f32 %v3079_v40, %v209_v1 }
  0x3f   :  { %546 = vmatpush.bf16.msra.mxu3 %v1971_v50  ;;  %v1927_v13 = vor.u32 %v2462_v10, %v1926_v8  ;;  %v1931_v14 = vor.u32 %v2460_v11, %v1928_v12  ;;  %v2014_v15 = vld [vmem:[#allocation5 + $0x128] sm:$0xf]  ;;  %v2483_v16 = vld [vmem:[#allocation5 + $0x138] sm:$0xf0]  ;;  %v2454_v19 = vld [vmem:[#allocation5 + $0x54] sm:$0xf] }
  0x40   :  { %v2015_v18 = vor.u32 %v2483_v16, %v2014_v15  ;;  %v1900_v20 = vld [vmem:[#allocation5 + $0x64] sm:$0xf0]  ;;  %v1906_v21 = vld [vmem:[#allocation5 + $0x58] sm:$0xf]  ;;  %v2457_v23 = vld [vmem:[#allocation5 + $0x68] sm:$0xf0]  ;;  %v211_v30 = vadd.f32 %v3079_v40, %v210_v17 }
  0x41   :  { %519 = vmatpush.bf16.msra.mxu1 %v1943_v58  ;;  %v1903_v22 = vor.u32 %v2454_v19, %v1900_v20  ;;  %v2455_v24 = vld [vmem:[#allocation5 + $0x5c] sm:$0xf]  ;;  %v1908_v25 = vld [vmem:[#allocation5 + $0x6c] sm:$0xf0]  ;;  %v1907_v26 = vor.u32 %v2457_v23, %v1906_v21  ;;  %v2478_v29 = vld [vmem:[#allocation5 + $0x110] sm:$0xf0] }
  0x42   :  { %506 = vmatpush.bf16.msra.mxu0 %v1919_v28  ;;  %533 = vmatpush.bf16.msra.mxu2 %v1947_v62  ;;  %v1911_v27 = vor.u32 %v2455_v24, %v1908_v25  ;;  %v1994_v28 = vld [vmem:[#allocation5 + $0x100] sm:$0xf]  ;;  %v2449_v32 = vld [vmem:[#allocation5 + $0x2c] sm:$0xf]  ;;  %v1886_v34 = vld [vmem:[#allocation5 + $0x30] sm:$0xf]  ;;  %v3086_v44 = vsel %vm212_vm0, %v3079_v40, %v211_v30 }
  0x43   :  { %547 = vmatpush.bf16.msra.mxu3 %v1951_v63  ;;  %v1995_v31 = vor.u32 %v2478_v29, %v1994_v28  ;;  %v1880_v33 = vld [vmem:[#allocation5 + $0x3c] sm:$0xf0]  ;;  %v2452_v36 = vld [vmem:[#allocation5 + $0x40] sm:$0xf0]  ;;  %v2450_v37 = vld [vmem:[#allocation5 + $0x34] sm:$0xf] }
  0x44   :  { %v1883_v35 = vor.u32 %v2449_v32, %v1880_v33  ;;  %v1888_v38 = vld [vmem:[#allocation5 + $0x44] sm:$0xf0]  ;;  %v1887_v39 = vor.u32 %v2452_v36, %v1886_v34  ;;  %v1974_v42 = vld [vmem:[#allocation5 + $0xd8] sm:$0xf]  ;;  %v2473_v43 = vld [vmem:[#allocation5 + $0xe8] sm:$0xf0] }
  0x45   :  { %520 = vmatpush.bf16.msra.mxu1 %v1923_v9  ;;  %v1975_v45 = vor.u32 %v2473_v43, %v1974_v42  ;;  %v2444_v46 = vld [vmem:[#allocation5 + $0x4] sm:$0xf]  ;;  %v1860_v47 = vld [vmem:[#allocation5 + $0x14] sm:$0xf0]  ;;  %v1866_v48 = vld [vmem:[#allocation5 + $0x8] sm:$0xf] }
  0x46   :  { %507 = vmatpush.bf16.msra.mxu0 %v1899_v41  ;;  %534 = vmatpush.bf16.msra.mxu2 %v1927_v13  ;;  %v1891_v41 = vor.u32 %v2450_v37, %v1888_v38  ;;  %v1863_v50 = vor.u32 %v2444_v46, %v1860_v47  ;;  %v2447_v51 = vld [vmem:[#allocation5 + $0x18] sm:$0xf0]  ;;  %v2445_v52 = vld [vmem:[#allocation5 + $0xc] sm:$0xf]  ;;  %v1868_v53 = vld [vmem:[#allocation5 + $0x1c] sm:$0xf0] }
  0x47   :  { %548 = vmatpush.bf16.msra.mxu3 %v1931_v14  ;;  %v1867_v55 = vor.u32 %v2447_v51, %v1866_v48  ;;  %v1871_v56 = vor.u32 %v2445_v52, %v1868_v53  ;;  %v1954_v57 = vld [vmem:[#allocation5 + $0xb0] sm:$0xf]  ;;  %v2468_v40 = vld [vmem:[#allocation5 + $0xc0] sm:$0xf0]  ;;  %v1934_v60 = vld [vmem:[#allocation5 + $0x88] sm:$0xf] }
  0x48   :  { %v1955_v58 = vor.u32 %v2468_v40, %v1954_v57  ;;  %v2463_v61 = vld [vmem:[#allocation5 + $0x98] sm:$0xf0]  ;;  %v1914_v63 = vld [vmem:[#allocation5 + $0x60] sm:$0xf]  ;;  %v2458_v1 = vld [vmem:[#allocation5 + $0x70] sm:$0xf0] }
  0x49   :  { %521 = vmatpush.bf16.msra.mxu1 %v1903_v22  ;;  %v1935_v62 = vor.u32 %v2463_v61, %v1934_v60  ;;  %v1915_v3 = vor.u32 %v2458_v1, %v1914_v63  ;;  %v1894_v5 = vld [vmem:[#allocation5 + $0x38] sm:$0xf]  ;;  %v2453_v6 = vld [vmem:[#allocation5 + $0x48] sm:$0xf0]  ;;  %v1874_v12 = vld [vmem:[#allocation5 + $0x10] sm:$0xf] }
  0x4a   :  { %508 = vmatpush.bf16.msra.mxu0 %v1879_v54  ;;  %535 = vmatpush.bf16.msra.mxu2 %v1907_v26  ;;  %v1895_v11 = vor.u32 %v2453_v6, %v1894_v5  ;;  %v2448_v13 = vld [vmem:[#allocation5 + $0x20] sm:$0xf0]  ;;  %v2608_v26 = vld [vmem:[%s3318_s1] ss:$0 sm:$0xff]  ;;  %v661_v33 = vld [vmem:[#allocation17 + $0x38] sm:$0xff] }
  0x4b   :  { %549 = vmatpush.bf16.msra.mxu3 %v1911_v27  ;;  %v1875_v16 = vor.u32 %v2448_v13, %v1874_v12  ;;  %v660_v34 = vld [vmem:[#allocation17 + $0x30] sm:$0xff]  ;;  %v658_v36 = vld [vmem:[#allocation17 + $0x20] sm:$0xff]  ;;  %v657_v37 = vld [vmem:[#allocation17 + $0x18] sm:$0xff] }
  0x4c   :  { %v656_v38 = vld [vmem:[#allocation17 + $0x10] sm:$0xff]  ;;  %v595_v47 = vld [vmem:[#allocation16 + $0x38] sm:$0xff]  ;;  %v593_v52 = vld [vmem:[#allocation16 + $0x28] sm:$0xff] }
  0x4d   :  { %522 = vmatpush.bf16.msra.mxu1 %v1883_v35  ;;  %v659_v35 = vld [vmem:[#allocation17 + $0x28] sm:$0xff]  ;;  %v573_v57 = vld [vmem:[#allocation11 + $0x8] sm:$0xff]  ;;  %v572_v60 = vld [vmem:[#allocation11] sm:$0xff] }
  0x4e   :  { %509 = vmatpush.bf16.msra.mxu0 %v1859_v4  ;;  %536 = vmatpush.bf16.msra.mxu2 %v1887_v39  ;;  %v655_v39 = vld [vmem:[#allocation17 + $0x8] sm:$0xff]  ;;  %v574_v61 = vld [vmem:[#allocation13] sm:$0xff] }
  0x4f   :  { %550 = vmatpush.bf16.msra.mxu3 %v1891_v41  ;;  %v654_v41 = vld [vmem:[#allocation17] sm:$0xff]  ;;  %v589_v5 = vld [vmem:[#allocation16 + $0x8] sm:$0xff] }
  0x51   :  { %523 = vmatpush.bf16.msra.mxu1 %v1863_v50 }
  0x52   :  { %558 = vmatpush.bf16.msrb.mxu0 %v2015_v18  ;;  %537 = vmatpush.bf16.msra.mxu2 %v1867_v55 }
  0x53   :  { %551 = vmatpush.bf16.msra.mxu3 %v1871_v56  ;;  %v591_v56 = vld [vmem:[#allocation16 + $0x18] sm:$0xff] }
  0x56   :  { %559 = vmatpush.bf16.msrb.mxu0 %v1995_v31 }
  0x57   :  { %676 = vmatpush.msrb.mxu3 %v661_v33 }
  0x59   :  { %677 = vmatpush.msrb.mxu3 %v660_v34 }
  0x5a   :  { %560 = vmatpush.bf16.msrb.mxu0 %v1975_v45 }
  0x5b   :  { %678 = vmatpush.msrb.mxu3 %v659_v35 }
  0x5d   :  { %679 = vmatpush.msrb.mxu3 %v658_v36  ;;  %v638_v36 = vld [vmem:[#allocation14 + $0x8] sm:$0xff] }
  0x5e   :  { %561 = vmatpush.bf16.msrb.mxu0 %v1955_v58 }
  0x5f   :  { %680 = vmatpush.msrb.mxu3 %v657_v37 }
  0x61   :  { %681 = vmatpush.msrb.mxu3 %v656_v38 }
  0x62   :  { %562 = vmatpush.bf16.msrb.mxu0 %v1935_v62  ;;  %v575_v62 = vld [vmem:[#allocation13 + $0x8] sm:$0xff] }
  0x63   :  { %682 = vmatpush.msrb.mxu3 %v655_v39 }
  0x65   :  { %683 = vmatpush.msrb.mxu3 %v654_v41 }
  0x66   :  { %563 = vmatpush.bf16.msrb.mxu0 %v1915_v3 }
  0x6a   :  { %564 = vmatpush.bf16.msrb.mxu0 %v1895_v11 }
  0x6e   :  { %565 = vmatpush.bf16.msrb.mxu0 %v1875_v16 }
  0xa4   :  { %v204_v49 = vpop.xlane.xlu0 %203 }
  0xa5   :  { %v214_v54 = vmul.f32 %v3086_v44, %v204_v49  ;;  %v594_v49 = vld [vmem:[#allocation16 + $0x30] sm:$0xff] }
  0xa7   :  { %v216_v59 = vadd.f32 1e-05, %v214_v54  ;;  %v592_v54 = vld [vmem:[#allocation16 + $0x20] sm:$0xff] }
  0xa9   :  { %2612 = vrsqrt.f32 %v216_v59  ;;  %vm224_vm2 = vweird.f32 %v216_v59 }
  0xac   :  { %v206_v2 = vpop.xlane.xlu0 %205 }
  0xad   :  { %v215_v4 = vmul.f32 %v3086_v44, %v206_v2 }
  0xaf   :  { %v2613_v8 = vpop.eup %2612  ;;  %v217_v9 = vadd.f32 1e-05, %v215_v4 }
  0xb0   :  { %v219_v10 = vmul.f32 %v2613_v8, %v216_v59  ;;  %vm225_vm1 = vweird.f32 %v2613_v8  ;;  %v590_v59 = vld [vmem:[#allocation16 + $0x10] sm:$0xff] }
  0xb1   :  { %2614 = vrsqrt.f32 %v217_v9  ;;  %vm226_vm3 = vmor %vm224_vm2, %vm225_vm1  ;;  %vm234_vm5 = vweird.f32 %v217_v9 }
  0xb2   :  { %v220_v14 = vmul.f32 %v2613_v8, %v219_v10  ;;  %v588_v10 = vld [vmem:[#allocation16] sm:$0xff] }
  0xb4   :  { %v221_v15 = vmul.f32 0.5, %v220_v14 }
  0xb6   :  { %v222_v17 = vsub.f32 1.5, %v221_v15 }
  0xb7   :  { %v2615_v18 = vpop.eup %2614 }
  0xb8   :  { %v229_v19 = vmul.f32 %v2615_v18, %v217_v9  ;;  %v223_v20 = vmul.f32 %v2613_v8, %v222_v17  ;;  %vm235_vm4 = vweird.f32 %v2615_v18 }
  0xb9   :  { %vm236_vm6 = vmor %vm234_vm5, %vm235_vm4 }
  0xba   :  { %v230_v21 = vmul.f32 %v2615_v18, %v229_v19  ;;  %v227_v23 = vsel %vm226_vm3, %v2613_v8, %v223_v20 }
  0xbb   :  { %v238_v27 = vmul.f32 %v227_v23, %v3071_v0 }
  0xbc   :  { %v231_v22 = vmul.f32 0.5, %v230_v21 }
  0xbd   :  { %v243_v30 = vmul.f32 %v2608_v26, %v238_v27 }
  0xbe   :  { %v232_v24 = vsub.f32 1.5, %v231_v22 }
  0xc0   :  { %v233_v25 = vmul.f32 %v2615_v18, %v232_v24 }
  0xc2   :  { %v237_v28 = vsel %vm236_vm6, %v2615_v18, %v233_v25 }
  0xc3   :  { %v239_v29 = vmul.f32 %v237_v28, %v3075_v7 }
  0xc5   :  { %v244_v31 = vmul.f32 %v2608_v26, %v239_v29 }
  0xc7   :  { %v245_v32 = vpack.c.bf16 %v244_v31, %v243_v30  ;;  %v637_v31 = vld [vmem:[#allocation14] sm:$0xff] }
  0xc9   :  { %510 = vmatmul.bf16.vlgmr.msra.gmra.mxu0 %v245_v32  ;;  %524 = vmatmul.bf16.vlgmr.msra.gmra.mxu1 %v245_v32 }
  0xca   :  { %538 = vmatmul.bf16.vlgmr.msra.gmra.mxu2 %v245_v32  ;;  %552 = vmatmul.bf16.vlgmr.msra.gmra.mxu3 %v245_v32 }
  0xd9   :  { %566 = vmatmul.bf16.vlgmr.msrb.gmra.mxu0 %v245_v32 }
 0x146   :  { %v511_v42 = vpop.f32.mrf.mxu0  ;;  %v525_v46 = vpop.f32.mrf.mxu1 }
 0x147   :  { %v582_v8 = vmul.f32 %v572_v60, %v525_v46  ;;  %v576_v24 = vmul.f32 %v572_v60, %v511_v42 }
 0x14d   :  { %v539_v43 = vpop.f32.mrf.mxu2  ;;  %v553_v20 = vpop.f32.mrf.mxu3 }
 0x14e   :  { %v3095_v45 = vpop.f32.mrf.mxu0  ;;  %v610_v53 = vmul.f32 %v594_v49, %v539_v43  ;;  %v527_v40 = vpop.f32.mrf.mxu1  ;;  %v608_v58 = vmul.f32 %v592_v54, %v539_v43  ;;  %v606_v6 = vmul.f32 %v590_v59, %v539_v43  ;;  %v604_v14 = vmul.f32 %v588_v10, %v539_v43 }
 0x14f   :  { %v583_v2 = vmul.f32 %v573_v57, %v527_v40  ;;  %v578_v22 = vmul.f32 %v574_v61, %v553_v20  ;;  %v577_v28 = vmul.f32 %v573_v57, %v3095_v45  ;;  %v2540_v20 = vld [vmem:[#allocation8 + $0x184] sm:$0xf] }
 0x151   :  { %v580_v25 = vadd.f32 %v578_v22, %v576_v24  ;;  %v2254_v24 = vld [vmem:[#allocation8 + $0x188] sm:$0xf] }
 0x155   :  { %v541_v48 = vpop.f32.mrf.mxu2  ;;  %v555_v26 = vpop.f32.mrf.mxu3 }
 0x156   :  { %v611_v50 = vmul.f32 %v595_v47, %v541_v48  ;;  %v567_v51 = vpop.f32.mrf.mxu0  ;;  %v609_v55 = vmul.f32 %v593_v52, %v541_v48  ;;  %v607_v1 = vmul.f32 %v591_v56, %v541_v48  ;;  %v605_v11 = vmul.f32 %v589_v5, %v541_v48 }
 0x157   :  { %v584_v3 = vmul.f32 %v574_v61, %v567_v51  ;;  %v579_v27 = vmul.f32 %v575_v62, %v555_v26  ;;  %v2490_v51 = vld [vmem:[#allocation7 + $0x30] sm:$0xff]  ;;  %v2541_v26 = vld [vmem:[#allocation8 + $0x18c] sm:$0xf] }
 0x158   :  { %713 = vmatpush.msra.mxu3 %v611_v50  ;;  %v2491_v50 = vld [vmem:[#allocation7 + $0x38] sm:$0xff] }
 0x159   :  { %v586_v12 = vadd.f32 %v584_v3, %v582_v8  ;;  %v581_v29 = vadd.f32 %v579_v27, %v577_v28  ;;  %793 = vmatpush.bf16.msrb.mxu2 %v2491_v50  ;;  %v2548_v8 = vld [vmem:[#allocation8 + $0x1c4] sm:$0xf]  ;;  %v2256_v28 = vld [vmem:[#allocation8 + $0x1a8] sm:$0xf0] }
 0x15a   :  { %714 = vmatpush.msra.mxu3 %v610_v53  ;;  %v2488_v53 = vld [vmem:[#allocation7 + $0x20] sm:$0xff] }
 0x15b   :  { %v602_v15 = vmul.f32 %v594_v49, %v586_v12  ;;  %v600_v17 = vmul.f32 %v592_v54, %v586_v12  ;;  %v598_v19 = vmul.f32 %v590_v59, %v586_v12  ;;  %v596_v23 = vmul.f32 %v588_v10, %v586_v12  ;;  %v2280_v10 = vld [vmem:[#allocation8 + $0x1e0] sm:$0xf0]  ;;  %v2553_v12 = vld [vmem:[#allocation8 + $0x1e4] sm:$0xf0] }
 0x15c   :  { %715 = vmatpush.msra.mxu3 %v609_v55  ;;  %v2487_v55 = vld [vmem:[#allocation7 + $0x18] sm:$0xff]  ;;  %v2524_v50 = vld [vmem:[#allocation8 + $0x104] sm:$0xf] }
 0x15d   :  { %794 = vmatpush.bf16.msrb.mxu2 %v2490_v51 }
 0x15e   :  { %716 = vmatpush.msra.mxu3 %v608_v58  ;;  %v569_v63 = vpop.f32.mrf.mxu0 }
 0x15f   :  { %v585_v4 = vmul.f32 %v575_v62, %v569_v63  ;;  %v2486_v62 = vld [vmem:[#allocation7 + $0x10] sm:$0xff]  ;;  %v2485_v63 = vld [vmem:[#allocation7 + $0x8] sm:$0xff] }
 0x160   :  { %717 = vmatpush.msra.mxu3 %v607_v1  ;;  %v2484_v1 = vld [vmem:[#allocation7] sm:$0xff] }
 0x161   :  { %v587_v9 = vadd.f32 %v585_v4, %v583_v2 }
 0x162   :  { %718 = vmatpush.msra.mxu3 %v606_v6  ;;  %v2552_v6 = vld [vmem:[#allocation8 + $0x1dc] sm:$0xf0] }
 0x163   :  { %v603_v13 = vmul.f32 %v595_v47, %v587_v9  ;;  %v601_v16 = vmul.f32 %v593_v52, %v587_v9  ;;  %v599_v18 = vmul.f32 %v591_v56, %v587_v9  ;;  %v597_v21 = vmul.f32 %v589_v5, %v587_v9  ;;  %v2489_v52 = vld [vmem:[#allocation7 + $0x28] sm:$0xff]  ;;  %v2278_v5 = vld [vmem:[#allocation8 + $0x1c0] sm:$0xf] }
 0x164   :  { %719 = vmatpush.msra.mxu3 %v605_v11  ;;  %795 = vmatpush.bf16.msrb.mxu2 %v2489_v52  ;;  %v2279_v9 = vor.u32 %v2552_v6, %v2278_v5  ;;  %v2286_v11 = vld [vmem:[#allocation8 + $0x1c8] sm:$0xf]  ;;  %v2184_v52 = vld [vmem:[#allocation8 + $0x120] sm:$0xf0]  ;;  %v2517_v5 = vld [vmem:[#allocation8 + $0xcc] sm:$0xf] }
 0x165   :  { %620 = vmatpush.xpose.msrb.mxu1 %v603_v13  ;;  %v2283_v13 = vor.u32 %v2548_v8, %v2280_v10  ;;  %v2160_v6 = vld [vmem:[#allocation8 + $0xe8] sm:$0xf0]  ;;  %v2512_v10 = vld [vmem:[#allocation8 + $0x9c] sm:$0xf0] }
 0x166   :  { %720 = vmatpush.msra.mxu3 %v604_v14  ;;  %v2287_v14 = vor.u32 %v2553_v12, %v2286_v11  ;;  %v2163_v8 = vor.u32 %v2517_v5, %v2160_v6  ;;  %v2508_v11 = vld [vmem:[#allocation8 + $0x84] sm:$0xf] }
 0x167   :  { %1246 = vmatpush.bf16.msra.mxu0 %v2283_v13  ;;  %v2120_v13 = vld [vmem:[#allocation8 + $0xa0] sm:$0xf0] }
 0x168   :  { %796 = vmatpush.bf16.msrb.mxu2 %v2488_v53  ;;  %v2190_v53 = vld [vmem:[#allocation8 + $0x108] sm:$0xf] }
 0x169   :  { %621 = vmatpush.xpose.msrb.mxu1 %v602_v15  ;;  %v2549_v15 = vld [vmem:[#allocation8 + $0x1cc] sm:$0xf] }
 0x16c   :  { %797 = vmatpush.bf16.msrb.mxu2 %v2487_v55  ;;  %v2187_v55 = vor.u32 %v2524_v50, %v2184_v52  ;;  %v2296_v50 = vld [vmem:[#allocation8 + $0x1f0] sm:$0xf0] }
 0x16d   :  { %622 = vmatpush.xpose.msrb.mxu1 %v601_v16  ;;  %v2288_v16 = vld [vmem:[#allocation8 + $0x1e8] sm:$0xf0] }
 0x170   :  { %798 = vmatpush.bf16.msrb.mxu2 %v2486_v62 }
 0x171   :  { %623 = vmatpush.xpose.msrb.mxu1 %v600_v17  ;;  %v2246_v17 = vld [vmem:[#allocation8 + $0x180] sm:$0xf] }
 0x174   :  { %799 = vmatpush.bf16.msrb.mxu2 %v2485_v63  ;;  %v2152_v63 = vld [vmem:[#allocation8 + $0xe0] sm:$0xf0] }
 0x175   :  { %624 = vmatpush.xpose.msrb.mxu1 %v599_v18  ;;  %v2291_v18 = vor.u32 %v2549_v15, %v2288_v16  ;;  %v2513_v15 = vld [vmem:[#allocation8 + $0xa4] sm:$0xf0]  ;;  %v2123_v16 = vor.u32 %v2508_v11, %v2120_v13  ;;  %v2238_v13 = vld [vmem:[#allocation8 + $0x158] sm:$0xf] }
 0x178   :  { %800 = vmatpush.bf16.msrb.mxu2 %v2484_v1  ;;  %v2158_v1 = vld [vmem:[#allocation8 + $0xc8] sm:$0xf] }
 0x179   :  { %625 = vmatpush.xpose.msrb.mxu1 %v598_v19  ;;  %v2544_v19 = vld [vmem:[#allocation8 + $0x19c] sm:$0xf0] }
 0x17a   :  { %v2247_v22 = vor.u32 %v2544_v19, %v2246_v17  ;;  %v2128_v19 = vld [vmem:[#allocation8 + $0xa8] sm:$0xf0] }
 0x17c   :  { %1274 = vmatpush.bf16.msra.mxu2 %v2291_v18  ;;  %v2509_v18 = vld [vmem:[#allocation8 + $0x8c] sm:$0xf] }
 0x17d   :  { %626 = vmatpush.xpose.msrb.mxu1 %v597_v21  ;;  %v2248_v21 = vld [vmem:[#allocation8 + $0x1a0] sm:$0xf0] }
 0x181   :  { %627 = vmatpush.xpose.msrb.mxu1 %v596_v23  ;;  %v2251_v23 = vor.u32 %v2540_v20, %v2248_v21  ;;  %v2131_v20 = vor.u32 %v2509_v18, %v2128_v19  ;;  %v2086_v21 = vld [vmem:[#allocation8 + $0x40] sm:$0xf]  ;;  %v2240_v18 = vld [vmem:[#allocation8 + $0x178] sm:$0xf0] }
 0x183   :  { %1247 = vmatpush.bf16.msra.mxu0 %v2251_v23  ;;  %v2500_v23 = vld [vmem:[#allocation8 + $0x44] sm:$0xf] }
 0x184   :  { %628 = vmatmul.f32.vlgmr.msrb.gmra.mxu1 %v580_v25  ;;  %v2545_v25 = vld [vmem:[#allocation8 + $0x1a4] sm:$0xf0] }
 0x185   :  { %1260 = vmatpush.bf16.msra.mxu1 %v2287_v14  ;;  %v2255_v27 = vor.u32 %v2545_v25, %v2254_v24  ;;  %v2126_v14 = vld [vmem:[#allocation8 + $0x88] sm:$0xf]  ;;  %v2088_v25 = vld [vmem:[#allocation8 + $0x60] sm:$0xf0] }
 0x186   :  { %v2127_v17 = vor.u32 %v2513_v15, %v2126_v14  ;;  %v2539_v14 = vld [vmem:[#allocation8 + $0x174] sm:$0xf0] }
 0x189   :  { %1261 = vmatpush.bf16.msra.mxu1 %v2255_v27  ;;  %v2505_v27 = vld [vmem:[#allocation8 + $0x64] sm:$0xf0] }
 0x18c   :  { %631 = vmatmul.f32.gmra.mxu1 %v581_v29  ;;  %v2259_v29 = vor.u32 %v2541_v26, %v2256_v28  ;;  %v2094_v26 = vld [vmem:[#allocation8 + $0x48] sm:$0xf]  ;;  %v2091_v28 = vor.u32 %v2500_v23, %v2088_v25  ;;  %v2530_v23 = vld [vmem:[#allocation8 + $0x12c] sm:$0xf0] }
 0x18e   :  { %1275 = vmatpush.bf16.msra.mxu2 %v2259_v29  ;;  %v2095_v29 = vor.u32 %v2505_v27, %v2094_v26  ;;  %v2200_v26 = vld [vmem:[#allocation8 + $0x130] sm:$0xf0]  ;;  %v2206_v27 = vld [vmem:[#allocation8 + $0x118] sm:$0xf] }
 0x201   :  { %v629_v30 = vpop.f32.mrf.mxu1 }
 0x202   :  { %v635_v32 = vmul.f32 0.17677669, %v629_v30 }
 0x204   :  { %v639_v33 = vadd.f32 %v637_v31, %v635_v32 }
 0x206   :  { %v642_v34 = vsel %vm641_vm7, %v639_v33, -inf }
 0x207   :  { %643 = vmax.xlane.f32.xlu1 %v642_v34 }
 0x209   :  { %v632_v35 = vpop.f32.mrf.mxu1 }
 0x20a   :  { %v636_v37 = vmul.f32 0.17677669, %v632_v35 }
 0x20c   :  { %v640_v38 = vadd.f32 %v638_v36, %v636_v37  ;;  %v2214_v36 = vld [vmem:[#allocation8 + $0x140] sm:$0xf] }
 0x20d   :  { %v2536_v37 = vld [vmem:[#allocation8 + $0x15c] sm:$0xf0] }
 0x20e   :  { %v645_v39 = vsel %vm641_vm7, %v640_v38, -inf }
 0x20f   :  { %646 = vmax.xlane.f32.xlu1 %v645_v39  ;;  %v2215_v39 = vor.u32 %v2536_v37, %v2214_v36  ;;  %v2496_v36 = vld [vmem:[#allocation8 + $0x1c] sm:$0xf0]  ;;  %v2492_v37 = vld [vmem:[#allocation8 + $0x4] sm:$0xf] }
 0x27a   :  { %v644_v41 = vpop.xlane.xlu1 %643 }
 0x27b   :  { %v648_v42 = vsub.f32 %v639_v33, %v644_v41  ;;  %v2216_v41 = vld [vmem:[#allocation8 + $0x160] sm:$0xf0] }
 0x27d   :  { %v650_v43 = vmul.f32 1.442695, %v648_v42  ;;  %v2222_v42 = vld [vmem:[#allocation8 + $0x148] sm:$0xf] }
 0x27f   :  { %2616 = vpow2.f32 %v650_v43 }
 0x282   :  { %v647_v45 = vpop.xlane.xlu1 %646 }
 0x283   :  { %v649_v46 = vsub.f32 %v640_v38, %v647_v45  ;;  %v2532_v38 = vld [vmem:[#allocation8 + $0x144] sm:$0xf] }
 0x284   :  { %v2219_v43 = vor.u32 %v2532_v38, %v2216_v41  ;;  %v2062_v41 = vld [vmem:[#allocation8 + $0x8] sm:$0xf] }
 0x285   :  { %v2617_v47 = vpop.eup %2616  ;;  %v652_v48 = vmul.f32 1.442695, %v649_v46  ;;  %v2533_v46 = vld [vmem:[#allocation8 + $0x14c] sm:$0xf] }
 0x286   :  { %2016 = vmatmul.msk.f32.vlgmr.msrb.gmra.mxu3 %vm641_vm7, %v2617_v47  ;;  %1248 = vmatpush.bf16.msra.mxu0 %v2219_v43 }
 0x287   :  { %2618 = vpow2.f32 %v652_v48  ;;  %1232 = vmatpush.bf16.msrb.mxu3 %v2279_v9  ;;  %v2118_v9 = vld [vmem:[#allocation8 + $0x80] sm:$0xf] }
 0x288   :  { %v2119_v12 = vor.u32 %v2512_v10, %v2118_v9  ;;  %v2538_v9 = vld [vmem:[#allocation8 + $0x16c] sm:$0xf0]  ;;  %v2534_v10 = vld [vmem:[#allocation8 + $0x154] sm:$0xf] }
 0x28a   :  { %1249 = vmatpush.bf16.msra.mxu0 %v2187_v55  ;;  %v2551_v55 = vld [vmem:[#allocation8 + $0x1dc] sm:$0xf] }
 0x28b   :  { %1233 = vmatpush.bf16.msrb.mxu3 %v2247_v22  ;;  %v2504_v22 = vld [vmem:[#allocation8 + $0x5c] sm:$0xf0] }
 0x28c   :  { %v2087_v24 = vor.u32 %v2504_v22, %v2086_v21  ;;  %v2198_v22 = vld [vmem:[#allocation8 + $0x110] sm:$0xf] }
 0x28d   :  { %v2619_v49 = vpop.eup %2618  ;;  %v2199_v25 = vor.u32 %v2530_v23, %v2198_v22  ;;  %v2495_v22 = vld [vmem:[#allocation8 + $0x1c] sm:$0xf] }
 0x28e   :  { %2017 = vmatmul.msk.f32.gmra.mxu3 %vm641_vm7, %v2619_v49  ;;  %v2080_v23 = vld [vmem:[#allocation8 + $0x38] sm:$0xf0] }
 0x28f   :  { %1234 = vmatpush.bf16.msrb.mxu3 %v2215_v39  ;;  %v2056_v39 = vld [vmem:[#allocation8 + $0x20] sm:$0xf0] }
 0x309   :  { %v685_v54 = vpop.f32.mrf.mxu3 }
 0x30a   :  { %2620 = vrcp.f32 %v685_v54  ;;  %vm693_vm8 = vcmp.gt.f32.partialorder %v685_v54, 0.0  ;;  %v2529_v54 = vld [vmem:[#allocation8 + $0x124] sm:$0xf0] }
 0x310   :  { %v2621_v56 = vpop.eup %2620 }
 0x311   :  { %v695_v57 = vmul.f32 %v2621_v56, %v2617_v47  ;;  %v688_v40 = vpop.f32.mrf.mxu3  ;;  %v2224_v47 = vld [vmem:[#allocation8 + $0x168] sm:$0xf0]  ;;  %v2191_v56 = vor.u32 %v2529_v54, %v2190_v53  ;;  %v2302_v53 = vld [vmem:[#allocation8 + $0x1d8] sm:$0xf] }
 0x312   :  { %2622 = vrcp.f32 %v688_v40  ;;  %vm694_vm9 = vcmp.gt.f32.partialorder %v688_v40, 0.0  ;;  %v2227_v48 = vor.u32 %v2533_v46, %v2224_v47  ;;  %v2192_v40 = vld [vmem:[#allocation8 + $0x128] sm:$0xf0]  ;;  %v2294_v47 = vld [vmem:[#allocation8 + $0x1d0] sm:$0xf] }
 0x313   :  { %v697_v58 = vsel %vm693_vm8, %v695_v57, 0.0  ;;  %v2525_v57 = vld [vmem:[#allocation8 + $0x10c] sm:$0xf]  ;;  %v2555_v54 = vld [vmem:[#allocation8 + $0x1f4] sm:$0xf0] }
 0x314   :  { %2018 = vmatmul.msk.f32.vlgmr.msra.gmra.mxu3 %vm641_vm7, %v697_v58  ;;  %1276 = vmatpush.bf16.msra.mxu2 %v2227_v48  ;;  %v2195_v58 = vor.u32 %v2525_v57, %v2192_v40  ;;  %v2064_v46 = vld [vmem:[#allocation8 + $0x28] sm:$0xf0]  ;;  %v2304_v57 = vld [vmem:[#allocation8 + $0x1f8] sm:$0xf0]  ;;  %v2262_v40 = vld [vmem:[#allocation8 + $0x190] sm:$0xf] }
 0x318   :  { %v2623_v59 = vpop.eup %2622  ;;  %1277 = vmatpush.bf16.msra.mxu2 %v2195_v58  ;;  %v2546_v58 = vld [vmem:[#allocation8 + $0x1ac] sm:$0xf0] }
 0x319   :  { %v696_v60 = vmul.f32 %v2623_v59, %v2619_v49  ;;  %v2528_v49 = vld [vmem:[#allocation8 + $0x11c] sm:$0xf0] }
 0x31a   :  { %v2150_v59 = vld [vmem:[#allocation8 + $0xc0] sm:$0xf] }
 0x31b   :  { %v698_v61 = vsel %vm694_vm9, %v696_v60, 0.0  ;;  %v2520_v60 = vld [vmem:[#allocation8 + $0xdc] sm:$0xf0] }
 0x31c   :  { %2019 = vmatmul.msk.f32.gmra.mxu3 %vm641_vm7, %v698_v61  ;;  %v2516_v61 = vld [vmem:[#allocation8 + $0xc4] sm:$0xf]  ;;  %v2151_v62 = vor.u32 %v2520_v60, %v2150_v59  ;;  %1278 = vmatpush.bf16.msra.mxu2 %v2163_v8  ;;  %v2307_v59 = vor.u32 %v2551_v55, %v2304_v57  ;;  %v2263_v60 = vor.u32 %v2546_v58, %v2262_v40  ;;  %v2230_v8 = vld [vmem:[#allocation8 + $0x150] sm:$0xf]  ;;  %v2142_v55 = vld [vmem:[#allocation8 + $0x98] sm:$0xf] }
 0x31d   :  { %v2231_v11 = vor.u32 %v2538_v9, %v2230_v8  ;;  %v2511_v57 = vld [vmem:[#allocation8 + $0x9c] sm:$0xf] }
 0x31e   :  { %v2503_v8 = vld [vmem:[#allocation8 + $0x5c] sm:$0xf] }
 0x31f   :  { %v2112_v9 = vld [vmem:[#allocation8 + $0x78] sm:$0xf0] }
 0x320   :  { %1279 = vmatpush.bf16.msra.mxu2 %v2131_v20 }
 0x397   :  { %v722_v2 = vpop.f32.mrf.mxu3 }
 0x39f   :  { %v725_v3 = vpop.f32.mrf.mxu3 }
 0x3a0   :  { %v728_v4 = vpack.c.bf16 %v725_v3, %v722_v2  ;;  %v2521_v2 = vld [vmem:[#allocation8 + $0xe4] sm:$0xf0]  ;;  %v2155_v3 = vor.u32 %v2516_v61, %v2152_v63  ;;  %v2542_v61 = vld [vmem:[#allocation8 + $0x194] sm:$0xf]  ;;  %v2270_v63 = vld [vmem:[#allocation8 + $0x198] sm:$0xf] }
 0x3a2   :  { %801 = vmatmul.bf16.vlgmr.msrb.gmra.mxu2 %v728_v4  ;;  %v2159_v4 = vor.u32 %v2521_v2, %v2158_v1  ;;  %1250 = vmatpush.bf16.msra.mxu0 %v2155_v3  ;;  %v2547_v2 = vld [vmem:[#allocation8 + $0x1b4] sm:$0xf0]  ;;  %v2543_v3 = vld [vmem:[#allocation8 + $0x19c] sm:$0xf] }
 0x3a3   :  { %v2271_v5 = vor.u32 %v2547_v2, %v2270_v63  ;;  %v2502_v2 = vld [vmem:[#allocation8 + $0x54] sm:$0xf] }
 0x3a6   :  { %1251 = vmatpush.bf16.msra.mxu0 %v2123_v16  ;;  %v2239_v16 = vor.u32 %v2539_v14, %v2238_v13  ;;  %v2070_v13 = vld [vmem:[#allocation8 + $0x10] sm:$0xf] }
 0x3aa   :  { %1252 = vmatpush.bf16.msra.mxu0 %v2091_v28  ;;  %v2531_v28 = vld [vmem:[#allocation8 + $0x134] sm:$0xf0] }
 0x425   :  { %v802_v30 = vpop.f32.mrf.mxu2 }
 0x426   :  { %v3105_v31 = vadd.f32 %v802_v30, %v3071_v0  ;;  %v2537_v0 = vld [vmem:[#allocation8 + $0x164] sm:$0xf0]  ;;  %v2501_v30 = vld [vmem:[#allocation8 + $0x4c] sm:$0xf] }
 0x427   :  { %v2223_v45 = vor.u32 %v2537_v0, %v2222_v42  ;;  %v2497_v42 = vld [vmem:[#allocation8 + $0x24] sm:$0xf0]  ;;  %v2059_v0 = vor.u32 %v2492_v37, %v2056_v39  ;;  %v2166_v37 = vld [vmem:[#allocation8 + $0xd0] sm:$0xf]  ;;  %v2518_v39 = vld [vmem:[#allocation8 + $0xd4] sm:$0xf] }
 0x428   :  { %v810_v32 = vmul.f32 %v3105_v31, %v3105_v31  ;;  %v2063_v43 = vor.u32 %v2497_v42, %v2062_v41  ;;  %v2168_v42 = vld [vmem:[#allocation8 + $0xf0] sm:$0xf0] }
 0x429   :  { %1262 = vmatpush.bf16.msra.mxu1 %v2223_v45  ;;  %v2493_v45 = vld [vmem:[#allocation8 + $0xc] sm:$0xf]  ;;  %1253 = vmatpush.bf16.msra.mxu0 %v2059_v0  ;;  %v2174_v0 = vld [vmem:[#allocation8 + $0xd8] sm:$0xf] }
 0x42a   :  { %812 = vadd.xlane.f32.xlu2 %v810_v32  ;;  %v2096_v32 = vld [vmem:[#allocation8 + $0x68] sm:$0xf0]  ;;  %v2067_v48 = vor.u32 %v2493_v45, %v2064_v46  ;;  %v2171_v45 = vor.u32 %v2518_v39, %v2168_v42 }
 0x42d   :  { %v804_v33 = vpop.f32.mrf.mxu2  ;;  %1263 = vmatpush.bf16.msra.mxu1 %v2191_v56  ;;  %v2303_v56 = vor.u32 %v2555_v54, %v2302_v53  ;;  %v2136_v53 = vld [vmem:[#allocation8 + $0xb0] sm:$0xf0] }
 0x42e   :  { %v3110_v34 = vadd.f32 %v804_v33, %v3075_v7  ;;  %v2182_v7 = vld [vmem:[#allocation8 + $0x100] sm:$0xf]  ;;  %v2099_v33 = vor.u32 %v2501_v30, %v2096_v32  ;;  %v2207_v32 = vor.u32 %v2531_v28, %v2206_v27 }
 0x42f   :  { %v2183_v51 = vor.u32 %v2528_v49, %v2182_v7  ;;  %v2554_v7 = vld [vmem:[#allocation8 + $0x1ec] sm:$0xf0]  ;;  %v2550_v49 = vld [vmem:[#allocation8 + $0x1d4] sm:$0xf] }
 0x430   :  { %v811_v35 = vmul.f32 %v3110_v34, %v3110_v34  ;;  %1280 = vmatpush.bf16.msra.mxu2 %v2099_v33  ;;  %v2299_v52 = vor.u32 %v2550_v49, %v2296_v50  ;;  %v2527_v33 = vld [vmem:[#allocation8 + $0x11c] sm:$0xf] }
 0x431   :  { %1235 = vmatpush.bf16.msrb.mxu3 %v2183_v51  ;;  %1264 = vmatpush.bf16.msra.mxu1 %v2159_v4  ;;  %v2295_v51 = vor.u32 %v2554_v7, %v2294_v47  ;;  %v2272_v4 = vld [vmem:[#allocation8 + $0x1b8] sm:$0xf0]  ;;  %v2134_v7 = vld [vmem:[#allocation8 + $0x90] sm:$0xf] }
 0x432   :  { %814 = vadd.xlane.f32.xlu2 %v811_v35  ;;  %v2054_v35 = vld [vmem:[#allocation8] sm:$0xf]  ;;  %1302 = vmatpush.bf16.msrb.mxu0 %v2299_v52  ;;  %v2275_v6 = vor.u32 %v2543_v3, %v2272_v4  ;;  %v2519_v47 = vld [vmem:[#allocation8 + $0xdc] sm:$0xf]  ;;  %v2510_v52 = vld [vmem:[#allocation8 + $0x94] sm:$0xf] }
 0x433   :  { %v2055_v38 = vor.u32 %v2496_v36, %v2054_v35  ;;  %v2208_v35 = vld [vmem:[#allocation8 + $0x138] sm:$0xf0]  ;;  %v2139_v58 = vor.u32 %v2510_v52, %v2136_v53  ;;  %v2104_v3 = vld [vmem:[#allocation8 + $0x70] sm:$0xf0]  ;;  %v2569_v52 = vld [vmem:[#allocation10 + $0x68] sm:$0xff] }
 0x434   :  { %1281 = vmatpush.bf16.msra.mxu2 %v2067_v48  ;;  %v2211_v36 = vor.u32 %v2527_v33, %v2208_v35  ;;  %v2176_v48 = vld [vmem:[#allocation8 + $0xf8] sm:$0xf0]  ;;  %v2577_v53 = vld [vmem:[#allocation10 + $0xa8] sm:$0xff] }
 0x435   :  { %1236 = vmatpush.bf16.msrb.mxu3 %v2151_v62  ;;  %1265 = vmatpush.bf16.msra.mxu1 %v2127_v17  ;;  %v2264_v62 = vld [vmem:[#allocation8 + $0x1b0] sm:$0xf0]  ;;  %v2535_v17 = vld [vmem:[#allocation8 + $0x15c] sm:$0xf]  ;;  %v2179_v50 = vor.u32 %v2519_v47, %v2176_v48 }
 0x436   :  { %v2267_v1 = vor.u32 %v2542_v61, %v2264_v62  ;;  %v2243_v20 = vor.u32 %v2535_v17, %v2240_v18  ;;  %v2506_v61 = vld [vmem:[#allocation8 + $0x6c] sm:$0xf0]  ;;  %v2072_v17 = vld [vmem:[#allocation8 + $0x30] sm:$0xf0]  ;;  %v2571_v47 = vld [vmem:[#allocation10 + $0x78] sm:$0xff] }
 0x437   :  { %v2579_v48 = vld [vmem:[#allocation10 + $0xb8] sm:$0xff] }
 0x438   :  { %1330 = vmatpush.bf16.msrb.mxu2 %v2307_v59  ;;  %1303 = vmatpush.bf16.msrb.mxu0 %v2267_v1  ;;  %v2144_v59 = vld [vmem:[#allocation8 + $0xb8] sm:$0xf0] }
 0x439   :  { %1237 = vmatpush.bf16.msrb.mxu3 %v2119_v12  ;;  %1266 = vmatpush.bf16.msra.mxu1 %v2095_v29  ;;  %v2232_v12 = vld [vmem:[#allocation8 + $0x170] sm:$0xf0] }
 0x43a   :  { %v2235_v15 = vor.u32 %v2534_v10, %v2232_v12  ;;  %v2107_v12 = vor.u32 %v2502_v2, %v2104_v3  ;;  %v2567_v3 = vld [vmem:[#allocation10 + $0x58] sm:$0xff] }
 0x43c   :  { %1331 = vmatpush.bf16.msrb.mxu2 %v2275_v6  ;;  %1304 = vmatpush.bf16.msrb.mxu0 %v2235_v15  ;;  %v2507_v6 = vld [vmem:[#allocation8 + $0x74] sm:$0xf0]  ;;  %v2498_v15 = vld [vmem:[#allocation8 + $0x2c] sm:$0xf0] }
 0x43d   :  { %1238 = vmatpush.bf16.msrb.mxu3 %v2087_v24  ;;  %1267 = vmatpush.bf16.msra.mxu1 %v2063_v43  ;;  %v2526_v24 = vld [vmem:[#allocation8 + $0x114] sm:$0xf]  ;;  %v2523_v43 = vld [vmem:[#allocation8 + $0xf4] sm:$0xf0] }
 0x43e   :  { %v2203_v30 = vor.u32 %v2526_v24, %v2200_v26  ;;  %v2175_v46 = vor.u32 %v2523_v43, %v2174_v0 }
 0x440   :  { %1332 = vmatpush.bf16.msrb.mxu2 %v2243_v20  ;;  %1305 = vmatpush.bf16.msrb.mxu0 %v2203_v30  ;;  %v2078_v20 = vld [vmem:[#allocation8 + $0x18] sm:$0xf] }
 0x441   :  { %1239 = vmatpush.bf16.msrb.mxu3 %v2055_v38  ;;  %1316 = vmatpush.bf16.msrb.mxu1 %v2303_v56  ;;  %v2522_v38 = vld [vmem:[#allocation8 + $0xec] sm:$0xf0]  ;;  %v2515_v56 = vld [vmem:[#allocation8 + $0xb4] sm:$0xf0] }
 0x442   :  { %v2167_v41 = vor.u32 %v2522_v38, %v2166_v37  ;;  %v2143_v1 = vor.u32 %v2515_v56, %v2142_v55 }
 0x444   :  { %1333 = vmatpush.bf16.msrb.mxu2 %v2211_v36  ;;  %1306 = vmatpush.bf16.msrb.mxu0 %v2171_v45 }
 0x445   :  { %1288 = vmatpush.bf16.msra.mxu3 %v2295_v51  ;;  %1317 = vmatpush.bf16.msrb.mxu1 %v2271_v5  ;;  %v2514_v51 = vld [vmem:[#allocation8 + $0xac] sm:$0xf0]  ;;  %v2110_v5 = vld [vmem:[#allocation8 + $0x58] sm:$0xf] }
 0x446   :  { %v2135_v40 = vor.u32 %v2514_v51, %v2134_v7  ;;  %v2111_v14 = vor.u32 %v2507_v6, %v2110_v5  ;;  %v2570_v7 = vld [vmem:[#allocation10 + $0x70] sm:$0xff]  ;;  %v2587_v51 = vld [vmem:[#allocation10 + $0xf8] sm:$0xff] }
 0x448   :  { %1334 = vmatpush.bf16.msrb.mxu2 %v2179_v50  ;;  %1307 = vmatpush.bf16.msrb.mxu0 %v2139_v58  ;;  %v2563_v50 = vld [vmem:[#allocation10 + $0x38] sm:$0xff] }
 0x449   :  { %1289 = vmatpush.bf16.msra.mxu3 %v2263_v60  ;;  %1318 = vmatpush.bf16.msrb.mxu1 %v2239_v16  ;;  %v2102_v60 = vld [vmem:[#allocation8 + $0x50] sm:$0xf]  ;;  %v2494_v16 = vld [vmem:[#allocation8 + $0x14] sm:$0xf] }
 0x44a   :  { %v2075_v26 = vor.u32 %v2494_v16, %v2072_v17  ;;  %v2566_v16 = vld [vmem:[#allocation10 + $0x50] sm:$0xff] }
 0x44b   :  { %v2574_v17 = vld [vmem:[#allocation10 + $0x90] sm:$0xff] }
 0x44c   :  { %1308 = vmatpush.bf16.msrb.mxu0 %v2107_v12 }
 0x44d   :  { %1290 = vmatpush.bf16.msra.mxu3 %v2231_v11  ;;  %1319 = vmatpush.bf16.msrb.mxu1 %v2207_v32  ;;  %v2103_v11 = vor.u32 %v2506_v61, %v2102_v60  ;;  %v2083_v32 = vor.u32 %v2495_v22, %v2080_v23  ;;  %v2576_v60 = vld [vmem:[#allocation10 + $0xa0] sm:$0xff]  ;;  %v2561_v61 = vld [vmem:[#allocation10 + $0x28] sm:$0xff] }
 0x44e   :  { %v2565_v22 = vld [vmem:[#allocation10 + $0x48] sm:$0xff] }
 0x44f   :  { %v2573_v23 = vld [vmem:[#allocation10 + $0x88] sm:$0xff] }
 0x450   :  { %1309 = vmatpush.bf16.msrb.mxu0 %v2075_v26 }
 0x451   :  { %1291 = vmatpush.bf16.msra.mxu3 %v2199_v25  ;;  %1320 = vmatpush.bf16.msrb.mxu1 %v2175_v46  ;;  %v2071_v25 = vor.u32 %v2498_v15, %v2070_v13 }
 0x455   :  { %1292 = vmatpush.bf16.msra.mxu3 %v2167_v41  ;;  %1321 = vmatpush.bf16.msrb.mxu1 %v2143_v1  ;;  %v2609_v41 = vld [vmem:[%s3319_s2] ss:$0 sm:$0xff]  ;;  %s2957_s2 = smov [#allocation19]  }
 0x456   :  { %s1836_s0 = sshll.u32 %s2957_s2, 4  ;;  %s1837_s0 = int_to_ptr.vmem [resolvable:$true] %s1836_s0 }
 0x459   :  { %1293 = vmatpush.bf16.msra.mxu3 %v2135_v40  ;;  %1322 = vmatpush.bf16.msrb.mxu1 %v2111_v14  ;;  %v2586_v40 = vld [vmem:[#allocation10 + $0xf0] sm:$0xff] }
 0x45d   :  { %1294 = vmatpush.bf16.msra.mxu3 %v2103_v11  ;;  %v2584_v11 = vld [vmem:[#allocation10 + $0xe0] sm:$0xff] }
 0x461   :  { %1295 = vmatpush.bf16.msra.mxu3 %v2071_v25 }
 0x49d   :  { %v813_v19 = vpop.xlane.xlu2 %812 }
 0x49e   :  { %v816_v21 = vmul.f32 %v813_v19, %v3086_v44  ;;  %v2115_v19 = vor.u32 %v2503_v8, %v2112_v9 }
 0x4a0   :  { %v3115_v29 = vadd.f32 1e-05, %v816_v21  ;;  %v2499_v21 = vld [vmem:[#allocation8 + $0x34] sm:$0xf0] }
 0x4a1   :  { %v2079_v28 = vor.u32 %v2499_v21, %v2078_v20 }
 0x4a2   :  { %2624 = vrsqrt.f32 %v3115_v29  ;;  %vm826_vm11 = vweird.f32 %v3115_v29 }
 0x4a3   :  { %1323 = vmatpush.bf16.msrb.mxu1 %v2079_v28  ;;  %v2558_v28 = vld [vmem:[#allocation10 + $0x10] sm:$0xff] }
 0x4a5   :  { %v815_v49 = vpop.xlane.xlu2 %814 }
 0x4a6   :  { %v817_v54 = vmul.f32 %v815_v49, %v3086_v44  ;;  %v2147_v44 = vor.u32 %v2511_v57, %v2144_v59  ;;  %v2578_v49 = vld [vmem:[#allocation10 + $0xb0] sm:$0xff]  ;;  %v2568_v59 = vld [vmem:[#allocation10 + $0x60] sm:$0xff] }
 0x4a7   :  { %v2562_v57 = vld [vmem:[#allocation10 + $0x30] sm:$0xff] }
 0x4a8   :  { %v2625_v62 = vpop.eup %2624  ;;  %v819_v63 = vadd.f32 1e-05, %v817_v54  ;;  %1335 = vmatpush.bf16.msrb.mxu2 %v2147_v44 }
 0x4a9   :  { %v821_v4 = vmul.f32 %v2625_v62, %v3115_v29  ;;  %vm827_vm10 = vweird.f32 %v2625_v62 }
 0x4aa   :  { %2626 = vrsqrt.f32 %v819_v63  ;;  %vm828_vm12 = vmor %vm826_vm11, %vm827_vm10  ;;  %vm836_vm14 = vweird.f32 %v819_v63 }
 0x4ab   :  { %v822_v10 = vmul.f32 %v2625_v62, %v821_v4  ;;  %v2575_v4 = vld [vmem:[#allocation10 + $0x98] sm:$0xff] }
 0x4ac   :  { %1336 = vmatpush.bf16.msrb.mxu2 %v2115_v19  ;;  %v2583_v19 = vld [vmem:[#allocation10 + $0xd8] sm:$0xff] }
 0x4ad   :  { %v823_v18 = vmul.f32 0.5, %v822_v10  ;;  %v2560_v10 = vld [vmem:[#allocation10 + $0x20] sm:$0xff] }
 0x4af   :  { %v824_v24 = vsub.f32 1.5, %v823_v18  ;;  %v2559_v18 = vld [vmem:[#allocation10 + $0x18] sm:$0xff] }
 0x4b0   :  { %v2627_v27 = vpop.eup %2626  ;;  %1337 = vmatpush.bf16.msrb.mxu2 %v2083_v32 }
 0x4b1   :  { %v831_v30 = vmul.f32 %v2627_v27, %v819_v63  ;;  %v825_v33 = vmul.f32 %v2625_v62, %v824_v24  ;;  %vm837_vm13 = vweird.f32 %v2627_v27 }
 0x4b2   :  { %vm838_vm15 = vmor %vm836_vm14, %vm837_vm13 }
 0x4b3   :  { %v832_v35 = vmul.f32 %v2627_v27, %v831_v30  ;;  %v829_v37 = vsel %vm828_vm12, %v2625_v62, %v825_v33  ;;  %v2585_v62 = vld [vmem:[#allocation10 + $0xe8] sm:$0xff]  ;;  %v2582_v30 = vld [vmem:[#allocation10 + $0xd0] sm:$0xff] }
 0x4b4   :  { %v840_v42 = vmul.f32 %v829_v37, %v3105_v31  ;;  %v2564_v37 = vld [vmem:[#allocation10 + $0x40] sm:$0xff] }
 0x4b5   :  { %v833_v36 = vmul.f32 0.5, %v832_v35 }
 0x4b6   :  { %v845_v45 = vmul.f32 %v2609_v41, %v840_v42 }
 0x4b7   :  { %v834_v38 = vsub.f32 1.5, %v833_v36 }
 0x4b9   :  { %v835_v39 = vmul.f32 %v2627_v27, %v834_v38  ;;  %v2572_v38 = vld [vmem:[#allocation10 + $0x80] sm:$0xff] }
 0x4bb   :  { %v839_v0 = vsel %vm838_vm15, %v2627_v27, %v835_v39 }
 0x4bc   :  { %v841_v43 = vmul.f32 %v839_v0, %v3110_v34 }
 0x4be   :  { %v846_v29 = vmul.f32 %v2609_v41, %v841_v43 }
 0x4c0   :  { %v847_v46 = vpack.c.bf16 %v846_v29, %v845_v45  ;;  %v2557_v45 = vld [vmem:[#allocation10 + $0x8] sm:$0xff] }
 0x4c2   :  { %1240 = vmatmul.bf16.vlgmr.msrb.gmra.mxu3 %v847_v46  ;;  %1254 = vmatmul.bf16.vlgmr.msra.gmra.mxu0 %v847_v46 }
 0x4c3   :  { %1268 = vmatmul.bf16.vlgmr.msra.gmra.mxu1 %v847_v46  ;;  %1282 = vmatmul.bf16.vlgmr.msra.gmra.mxu2 %v847_v46 }
 0x4c4   :  { %1786 = vmatpush.bf16.msra.mxu0 %v2571_v47  ;;  %1800 = vmatpush.bf16.msra.mxu1 %v2579_v48  ;;  %v2581_v47 = vld [vmem:[#allocation10 + $0xc8] sm:$0xff] }
 0x4c5   :  { %1772 = vmatpush.bf16.msrb.mxu3 %v2563_v50  ;;  %1814 = vmatpush.bf16.msra.mxu2 %v2587_v51 }
 0x4c8   :  { %1787 = vmatpush.bf16.msra.mxu0 %v2570_v7  ;;  %1801 = vmatpush.bf16.msra.mxu1 %v2578_v49 }
 0x4c9   :  { %1773 = vmatpush.bf16.msrb.mxu3 %v2562_v57  ;;  %1815 = vmatpush.bf16.msra.mxu2 %v2586_v40  ;;  %v2556_v40 = vld [vmem:[#allocation10] sm:$0xff] }
 0x4cc   :  { %1788 = vmatpush.bf16.msra.mxu0 %v2569_v52  ;;  %1802 = vmatpush.bf16.msra.mxu1 %v2577_v53 }
 0x4cd   :  { %1774 = vmatpush.bf16.msrb.mxu3 %v2561_v61  ;;  %1816 = vmatpush.bf16.msra.mxu2 %v2585_v62 }
 0x4d0   :  { %1789 = vmatpush.bf16.msra.mxu0 %v2568_v59  ;;  %1803 = vmatpush.bf16.msra.mxu1 %v2576_v60 }
 0x4d1   :  { %1775 = vmatpush.bf16.msrb.mxu3 %v2560_v10  ;;  %1817 = vmatpush.bf16.msra.mxu2 %v2584_v11 }
 0x4d2   :  { %1296 = vmatmul.bf16.vlgmr.msra.gmra.mxu3 %v847_v46  ;;  %1310 = vmatmul.bf16.vlgmr.msrb.gmra.mxu0 %v847_v46 }
 0x4d3   :  { %1324 = vmatmul.bf16.vlgmr.msrb.gmra.mxu1 %v847_v46  ;;  %1338 = vmatmul.bf16.vlgmr.msrb.gmra.mxu2 %v847_v46 }
 0x4d4   :  { %1790 = vmatpush.bf16.msra.mxu0 %v2567_v3  ;;  %1804 = vmatpush.bf16.msra.mxu1 %v2575_v4 }
 0x4d5   :  { %1776 = vmatpush.bf16.msrb.mxu3 %v2559_v18  ;;  %1818 = vmatpush.bf16.msra.mxu2 %v2583_v19 }
 0x4d8   :  { %1791 = vmatpush.bf16.msra.mxu0 %v2566_v16  ;;  %1805 = vmatpush.bf16.msra.mxu1 %v2574_v17 }
 0x4d9   :  { %1777 = vmatpush.bf16.msrb.mxu3 %v2558_v28  ;;  %1819 = vmatpush.bf16.msra.mxu2 %v2582_v30 }
 0x4dc   :  { %1792 = vmatpush.bf16.msra.mxu0 %v2565_v22  ;;  %1806 = vmatpush.bf16.msra.mxu1 %v2573_v23 }
 0x4dd   :  { %1778 = vmatpush.bf16.msrb.mxu3 %v2557_v45  ;;  %1820 = vmatpush.bf16.msra.mxu2 %v2581_v47 }
 0x4e0   :  { %1793 = vmatpush.bf16.msra.mxu0 %v2564_v37  ;;  %1807 = vmatpush.bf16.msra.mxu1 %v2572_v38 }
 0x4e1   :  { %1779 = vmatpush.bf16.msrb.mxu3 %v2556_v40 }
 0x53f   :  { %v3126_v54 = vpop.f32.mrf.mxu0 }
 0x540   :  { %v2309_v55 = vmul.f32 -1.442695, %v3126_v54  ;;  %v3129_v56 = vpop.f32.mrf.mxu1 }
 0x541   :  { %v2310_v58 = vmul.f32 -1.442695, %v3129_v56 }
 0x542   :  { %2628 = vpow2.f32 %v2309_v55 }
 0x543   :  { %2630 = vpow2.f32 %v2310_v58  ;;  %v2580_v58 = vld [vmem:[#allocation10 + $0xc0] sm:$0xff] }
 0x544   :  { %1821 = vmatpush.bf16.msra.mxu2 %v2580_v58 }
 0x545   :  { %v3132_v63 = vpop.f32.mrf.mxu3 }
 0x546   :  { %v2308_v1 = vmul.f32 -1.442695, %v3132_v63  ;;  %v3135_v2 = vpop.f32.mrf.mxu2 }
 0x547   :  { %v2311_v44 = vmul.f32 -1.442695, %v3135_v2  ;;  %v3138_v5 = vpop.f32.mrf.mxu0 }
 0x548   :  { %v2629_v6 = vpop.eup %2628  ;;  %2632 = vpow2.f32 %v2308_v1  ;;  %v2313_v8 = vmul.f32 -1.442695, %v3138_v5  ;;  %v3141_v9 = vpop.f32.mrf.mxu1 }
 0x549   :  { %v2631_v12 = vpop.eup %2630  ;;  %v3143_v13 = vadd.f32 1.0, %v2629_v6  ;;  %2634 = vpow2.f32 %v2311_v44  ;;  %v2314_v14 = vmul.f32 -1.442695, %v3141_v9 }
 0x54a   :  { %v3146_v15 = vadd.f32 1.0, %v2631_v12  ;;  %2636 = vpow2.f32 %v2313_v8 }
 0x54b   :  { %2638 = vrcp.f32 %v3143_v13  ;;  %v1400_v50 = vand.u32 2147483647, %v3143_v13  ;;  %v1402_v51 = vand.u32 2147483648, %v3143_v13  ;;  %vm1396_vm0 = vweird.f32 %v3143_v13 }
 0x54c   :  { %2640 = vrcp.f32 %v3146_v15  ;;  %v1415_v53 = vand.u32 2147483647, %v3146_v15  ;;  %v1417_v55 = vand.u32 2147483648, %v3146_v15  ;;  %vm1411_vm3 = vweird.f32 %v3146_v15 }
 0x54d   :  { %2642 = vpow2.f32 %v2314_v14  ;;  %v3150_v20 = vpop.f32.mrf.mxu3  ;;  %vm3192_vm2 = vcmp.eq.f32.partialorder %v1400_v50, 8.507059e+37  ;;  %v1403_v44 = vor.u32 1.1754944e-38, %v1402_v51 }
 0x54e   :  { %v2633_v21 = vpop.eup %2632  ;;  %v2312_v27 = vmul.f32 -1.442695, %v3150_v20  ;;  %v3166_v42 = vpop.f32.mrf.mxu2  ;;  %vm3199_vm5 = vcmp.eq.f32.partialorder %v1415_v53, 8.507059e+37  ;;  %v1418_v8 = vor.u32 1.1754944e-38, %v1417_v55 }
 0x54f   :  { %v2635_v24 = vpop.eup %2634  ;;  %v3152_v25 = vadd.f32 1.0, %v2633_v21  ;;  %v2315_v7 = vmul.f32 -1.442695, %v3166_v42  ;;  %v1311_v23 = vpop.f32.mrf.mxu0 }
 0x550   :  { %v2637_v26 = vpop.eup %2636  ;;  %v3158_v33 = vadd.f32 1.0, %v2635_v24 }
 0x551   :  { %v3155_v32 = vpop.eup %2638  ;;  %2644 = vrcp.f32 %v3152_v25  ;;  %v3168_v43 = vadd.f32 1.0, %v2637_v26  ;;  %v1387_v59 = vand.u32 2147483648, %v3152_v25  ;;  %v1385_v12 = vand.u32 2147483647, %v3152_v25 }
 0x552   :  { %v3160_v35 = vpop.eup %2640  ;;  %v1392_v36 = vmul.f32 %v3155_v32, %v3143_v13  ;;  %2646 = vpow2.f32 %v2312_v27  ;;  %vm1397_vm1 = vweird.f32 %v3155_v32  ;;  %v1430_v16 = vand.u32 2147483647, %v3158_v33 }
 0x553   :  { %v2643_v39 = vpop.eup %2642  ;;  %v1407_v41 = vmul.f32 %v3160_v35, %v3146_v15  ;;  %2648 = vrcp.f32 %v3158_v33  ;;  %vm1412_vm4 = vweird.f32 %v3160_v35  ;;  %vm3205_vm6 = vmor %vm1396_vm0, %vm1397_vm1  ;;  %v3210_v14 = vor.u32 1.1754944e-38, %v1387_v59 }
 0x554   :  { %v1393_v0 = vsub.f32 1.0, %v1392_v36  ;;  %v3171_v46 = vadd.f32 1.0, %v2643_v39  ;;  %2650 = vrcp.f32 %v3168_v43  ;;  %vm3219_vm7 = vmor %vm1411_vm3, %vm1412_vm4  ;;  %vm1381_vm8 = vweird.f32 %v3152_v25  ;;  %v1325_v36 = vpop.f32.mrf.mxu1 }
 0x555   :  { %v1408_v29 = vsub.f32 1.0, %v1407_v41  ;;  %vm1456_vm9 = vweird.f32 %v3168_v43  ;;  %v1460_v15 = vand.u32 2147483647, %v3168_v43  ;;  %vm3244_vm12 = vcmp.eq.f32.partialorder %v1385_v12, 8.507059e+37 }
 0x556   :  { %v1394_v48 = vmul.f32 %v3155_v32, %v1393_v0  ;;  %2652 = vrcp.f32 %v3171_v46  ;;  %v1475_v0 = vand.u32 2147483647, %v3171_v46  ;;  %v1477_v45 = vand.u32 2147483648, %v3171_v46 }
 0x557   :  { %v3176_v49 = vpop.eup %2644  ;;  %v1409_v52 = vmul.f32 %v3160_v35, %v1408_v29  ;;  %2654 = vpow2.f32 %v2315_v7  ;;  %vm1461_vm15 = vcmp.eq.f32.partialorder %v1460_v15, 8.507059e+37  ;;  %vm1471_vm0 = vweird.f32 %v3171_v46 }
 0x558   :  { %v1377_v57 = vmul.f32 %v3176_v49, %v3152_v25  ;;  %v2647_v60 = vpop.eup %2646  ;;  %v1395_v61 = vadd.f32 %v3155_v32, %v1394_v48  ;;  %vm1382_vm10 = vweird.f32 %v3176_v49  ;;  %vm1476_vm3 = vcmp.eq.f32.partialorder %v1475_v0, 8.507059e+37  ;;  %v1297_v25 = vpop.f32.mrf.mxu3 }
 0x559   :  { %v3190_v62 = vpop.eup %2648  ;;  %v1410_v3 = vadd.f32 %v3160_v35, %v1409_v52  ;;  %v3227_v22 = vadd.f32 1.0, %v2647_v60  ;;  %v1432_v1 = vand.u32 2147483648, %v3158_v33 }
 0x55a   :  { %v2651_v4 = vpop.eup %2650  ;;  %v1378_v10 = vsub.f32 1.0, %v1377_v57  ;;  %v1399_v19 = vsel %vm3205_vm6, %v3155_v32, %v1395_v61  ;;  %v1422_v21 = vmul.f32 %v3190_v62, %v3158_v33  ;;  %v1462_v32 = vand.u32 2147483648, %v3168_v43 }
 0x55b   :  { %v1452_v17 = vmul.f32 %v2651_v4, %v3168_v43  ;;  %v1414_v24 = vsel %vm3219_vm7, %v3160_v35, %v1410_v3  ;;  %2656 = vrcp.f32 %v3227_v22  ;;  %v1404_v37 = vsel %vm3192_vm2, %v1403_v44, %v1399_v19  ;;  %vm3263_vm2 = vmor %vm1381_vm8, %vm1382_vm10 }
 0x55c   :  { %v2653_v18 = vpop.eup %2652  ;;  %v1379_v30 = vmul.f32 %v3176_v49, %v1378_v10  ;;  %vm1457_vm11 = vweird.f32 %v2651_v4  ;;  %v1419_v39 = vsel %vm3199_vm5, %v1418_v8, %v1414_v24  ;;  %v1423_v41 = vsub.f32 1.0, %v1422_v21 }
 0x55d   :  { %v1453_v26 = vsub.f32 1.0, %v1452_v17  ;;  %v1467_v27 = vmul.f32 %v2653_v18, %v3171_v46  ;;  %v2655_v28 = vpop.eup %2654  ;;  %vm1472_vm13 = vweird.f32 %v2653_v18  ;;  %vm1458_vm14 = vmor %vm1456_vm9, %vm1457_vm11  ;;  %v1463_v51 = vor.u32 1.1754944e-38, %v1462_v32 }
 0x55e   :  { %v3248_v7 = vadd.f32 1.0, %v2655_v28  ;;  %v1380_v50 = vadd.f32 %v3176_v49, %v1379_v30  ;;  %v1497_v52 = vmul.f32 %v1404_v37, %v3126_v54  ;;  %v1498_v40 = vmul.f32 %v1419_v39, %v3129_v56  ;;  %vm1473_vm1 = vmor %vm1471_vm0, %vm1472_vm13 }
 0x55f   :  { %v1454_v38 = vmul.f32 %v2651_v4, %v1453_v26  ;;  %v1468_v35 = vsub.f32 1.0, %v1467_v27  ;;  %v1424_v58 = vmul.f32 %v3190_v62, %v1423_v41  ;;  %v1478_v43 = vor.u32 1.1754944e-38, %v1477_v45 }
 0x560   :  { %2658 = vrcp.f32 %v3248_v7  ;;  %v1384_v61 = vsel %vm3263_vm2, %v3176_v49, %v1380_v50  ;;  %vm1427_vm4 = vweird.f32 %v3190_v62  ;;  %v1505_v8 = vmul.f32 %v1497_v52, %v1311_v23  ;;  %v1327_v49 = vpop.f32.mrf.mxu1  ;;  %v1299_v0 = vpop.f32.mrf.mxu3 }
 0x561   :  { %v1455_v47 = vadd.f32 %v2651_v4, %v1454_v38  ;;  %v1469_v48 = vmul.f32 %v2653_v18, %v1468_v35  ;;  %v2657_v57 = vpop.eup %2656  ;;  %v1425_v10 = vadd.f32 %v3190_v62, %v1424_v58  ;;  %v1445_v11 = vand.u32 2147483647, %v3227_v22 }
 0x562   :  { %v1437_v56 = vmul.f32 %v2657_v57, %v3227_v22  ;;  %v1447_v12 = vand.u32 2147483648, %v3227_v22  ;;  %v1506_v17 = vmul.f32 %v1498_v40, %v1325_v36  ;;  %vm1442_vm5 = vweird.f32 %v2657_v57 }
 0x563   :  { %v1459_v53 = vsel %vm1458_vm14, %v2651_v4, %v1455_v47  ;;  %v1470_v55 = vadd.f32 %v2653_v18, %v1469_v48  ;;  %v1313_v4 = vpop.f32.mrf.mxu0  ;;  %vm1426_vm6 = vweird.f32 %v3158_v33  ;;  %vm3291_vm8 = vcmp.eq.f32.partialorder %v1430_v16, 8.507059e+37 }
 0x564   :  { %v1464_v59 = vsel %vm1461_vm15, %v1463_v51, %v1459_v53  ;;  %v1438_v6 = vsub.f32 1.0, %v1437_v56  ;;  %vm3285_vm7 = vmor %vm1426_vm6, %vm1427_vm4  ;;  %vm1441_vm9 = vweird.f32 %v3227_v22  ;;  %v1433_v30 = vor.u32 1.1754944e-38, %v1432_v1 }
 0x565   :  { %v1501_v54 = vmul.f32 %v1464_v59, %v3138_v5  ;;  %v1474_v60 = vsel %vm1473_vm1, %v2653_v18, %v1470_v55  ;;  %v1429_v28 = vsel %vm3285_vm7, %v3190_v62, %v1425_v10  ;;  %vm1443_vm10 = vmor %vm1441_vm9, %vm1442_vm5  ;;  %v1448_v32 = vor.u32 1.1754944e-38, %v1447_v12 }
 0x566   :  { %v1479_v3 = vsel %vm1476_vm3, %v1478_v43, %v1474_v60  ;;  %v2659_v18 = vpop.eup %2658  ;;  %v1439_v19 = vmul.f32 %v2657_v57, %v1438_v6  ;;  %vm1446_vm11 = vcmp.eq.f32.partialorder %v1445_v11, 8.507059e+37  ;;  %v1492_v37 = vand.u32 2147483648, %v3248_v7 }
 0x567   :  { %v1502_v44 = vmul.f32 %v1479_v3, %v3141_v9  ;;  %v1509_v5 = vmul.f32 %v1501_v54, %v1313_v4  ;;  %v1389_v9 = vsel %vm3244_vm12, %v3210_v14, %v1384_v61  ;;  %v1482_v23 = vmul.f32 %v2659_v18, %v3248_v7  ;;  %v1339_v14 = vpop.f32.mrf.mxu2 }
 0x568   :  { %v1440_v15 = vadd.f32 %v2657_v57, %v1439_v19  ;;  %v1496_v33 = vmul.f32 %v1389_v9, %v3132_v63  ;;  %vm1487_vm12 = vweird.f32 %v2659_v18  ;;  %v1490_v35 = vand.u32 2147483647, %v3248_v7 }
 0x569   :  { %v1513_v13 = vpack.c.bf16 %v1509_v5, %v1505_v8  ;;  %v1510_v21 = vmul.f32 %v1502_v44, %v1327_v49  ;;  %v1483_v36 = vsub.f32 1.0, %v1482_v23  ;;  %v1434_v62 = vsel %vm3291_vm8, %v1433_v30, %v1429_v28 }
 0x56a   :  { %v1444_v16 = vsel %vm1443_vm10, %v2657_v57, %v1440_v15  ;;  %vm1486_vm13 = vweird.f32 %v3248_v7  ;;  %v1493_v63 = vor.u32 1.1754944e-38, %v1492_v37  ;;  %v1504_v45 = vmul.f32 %v1496_v33, %v1297_v25 }
 0x56b   :  { %v1514_v27 = vpack.c.bf16 %v1510_v21, %v1506_v17  ;;  %1794 = vmatmul.bf16.vlgmr.msra.gmra.mxu0 %v1513_v13  ;;  %v1449_v22 = vsel %vm1446_vm11, %v1448_v32, %v1444_v16  ;;  %v1484_v38 = vmul.f32 %v2659_v18, %v1483_v36  ;;  %vm1488_vm14 = vmor %vm1486_vm13, %vm1487_vm12  ;;  %v1499_v47 = vmul.f32 %v1434_v62, %v3135_v2 }
 0x56c   :  { %v1500_v39 = vmul.f32 %v1449_v22, %v3150_v20  ;;  %vm1491_vm15 = vcmp.eq.f32.partialorder %v1490_v35, 8.507059e+37 }
 0x56d   :  { %1808 = vmatmul.bf16.vlgmr.msra.gmra.mxu1 %v1514_v27  ;;  %v1485_v41 = vadd.f32 %v2659_v18, %v1484_v38  ;;  %v1507_v55 = vmul.f32 %v1499_v47, %v1339_v14 }
 0x56e   :  { %v1508_v29 = vmul.f32 %v1500_v39, %v1299_v0 }
 0x56f   :  { %v1489_v48 = vsel %vm1488_vm14, %v2659_v18, %v1485_v41  ;;  %v1341_v53 = vpop.f32.mrf.mxu2 }
 0x570   :  { %v1494_v50 = vsel %vm1491_vm15, %v1493_v63, %v1489_v48  ;;  %v1512_v51 = vpack.c.bf16 %v1508_v29, %v1504_v45 }
 0x571   :  { %v1503_v52 = vmul.f32 %v1494_v50, %v3166_v42 }
 0x572   :  { %1780 = vmatmul.bf16.vlgmr.msrb.gmra.mxu3 %v1512_v51 }
 0x573   :  { %v1511_v20 = vmul.f32 %v1503_v52, %v1341_v53 }
 0x575   :  { %v1515_v57 = vpack.c.bf16 %v1511_v20, %v1507_v55 }
 0x577   :  { %1822 = vmatmul.bf16.vlgmr.msra.gmra.mxu2 %v1515_v57 }
 0x5e8   :  { %v1795_v7 = vpop.f32.mrf.mxu0 }
 0x5ea   :  { %v1809_v40 = vpop.f32.mrf.mxu1 }
 0x5f0   :  { %v1797_v2 = vpop.f32.mrf.mxu0 }
 0x5f2   :  { %v1811_v1 = vpop.f32.mrf.mxu1 }
 0x5f5   :  { %v1781_v58 = vpop.f32.mrf.mxu3 }
 0x5f6   :  { %v1796_v59 = vadd.f32 %v1795_v7, %v1781_v58 }
 0x5f8   :  { %v1810_v43 = vadd.f32 %v1809_v40, %v1796_v59 }
 0x5fa   :  { %v1823_v46 = vpop.f32.mrf.mxu2 }
 0x5fb   :  { %v1824_v54 = vadd.f32 %v1823_v46, %v1810_v43 }
 0x5fd   :  { %v1828_v60 = vadd.f32 %v1824_v54, %v3105_v31  ;;  %v1783_v56 = vpop.f32.mrf.mxu3 }
 0x5fe   :  { %v1798_v61 = vadd.f32 %v1797_v2, %v1783_v56 }
 0x5ff   :  { %1830 = vst [vmem:[#allocation19] sm:$0xff] %v1828_v60 }
 0x600   :  { %v1812_v42 = vadd.f32 %v1811_v1, %v1798_v61 }
 0x602   :  { %v1825_v3 = vpop.f32.mrf.mxu2 }
 0x603   :  { %v1826_v25 = vadd.f32 %v1825_v3, %v1812_v42 }
 0x605   :  { %v1829_v4 = vadd.f32 %v1826_v25, %v3110_v34 }
 0x607   :  { %1831 = vst [vmem:[#allocation19 + $0x8] sm:$0xff] %v1829_v4 }
 0x608   :  { %1844 = dma.vmem_to_hbm [thread:$0]  %s1837_s0, 256, %s1839_s17, [#allocation4], %s2945_s23, %s2945_s23, %s2946_s24  }
 0x609   :  { %2936 = dma.done.wait [#allocation4], 256  }
 0x60a   :  { %2937 = vsyncadd [#allocation4], 4294967040 }
 0x60b   :  { %1849 = vsyncpa [#allocation3], 1 }
 0x60c   :  { %1850 = vsyncpa [#allocation6], 1 }
 0x60d   :  { %1851 = vsyncpa [#allocation9], 1 }
 0x60e   :  { %1852 = vsyncpa [#allocation12], 1 }
 0x60f   :  { %1853 = vsyncpa [#allocation15], 1 }
 0x610   :  { %1854 = vsyncpa [#allocation18], 1 }
 0x611   :  { %1855 = vsyncpa [#allocation4], 1 }

</bundles_post_ra>
